<compile_context>
chip_gen: v5e
topology: v5e:2x2
jax: 0.10.0
libtpu: 0.0.40
codegen_flags: <defaults>
</compile_context>

<pallas_src>
import functools

import jax
import jax.numpy as jnp
from jax.experimental import pallas as pl
from jax.experimental.pallas import tpu as pltpu


def _attn_kernel(x_ref, wq_ref, wv_ref, bv_ref, wt_ref, bt_ref,
                 y_ref, ysum_ref, ysq_ref,
                 q_scr, xr_acc, col_acc, *, tq):
    t = pl.program_id(1)
    n_t = pl.num_programs(1)

    @pl.when(t == 0)
    def _init():
        # Shared q/k projection for the whole batch element, kept resident
        # in VMEM scratch (bf16) across all query tiles.
        xb = x_ref[0].astype(jnp.bfloat16)                                # (C, N)
        q_scr[...] = jnp.dot(wq_ref[...].astype(jnp.bfloat16), xb,
                             preferred_element_type=jnp.float32
                             ).astype(jnp.bfloat16)                       # (Cq, N)
        xr_acc[...] = jnp.zeros_like(xr_acc)
        col_acc[...] = jnp.zeros_like(col_acc)

    start = t * tq
    if tq % 128 == 0:
        start = pl.multiple_of(start, 128)

    x_t = x_ref[0, :, pl.ds(start, tq)]                                   # (C, TQ) f32
    q_t = q_scr[:, pl.ds(start, tq)]                                      # (Cq, TQ) bf16

    # energy tile: contract over Cq directly (dim-0 contraction on both sides)
    # so no explicit transpose of q is materialized.
    energy = jax.lax.dot_general(
        q_t, q_scr[...],
        dimension_numbers=(((0,), (0,)), ((), ())),
        preferred_element_type=jnp.float32)                               # (TQ, N) f32

    # Row softmax in f32 (rows are complete inside a query tile).
    m = jnp.max(energy, axis=-1, keepdims=True)                           # (TQ, 1)
    e = jnp.exp(energy - m)
    inv_rowsum = pl.reciprocal(jnp.sum(e, axis=-1, keepdims=True), approx=True)
    attn = e * inv_rowsum                                                 # (TQ, N)

    # v projection for this query tile only.
    v_t = jnp.dot(wv_ref[...].astype(jnp.bfloat16),
                  x_t.astype(jnp.bfloat16),
                  preferred_element_type=jnp.float32) + bv_ref[...]       # (C, TQ)

    # Accumulate x_r and the column sums.  The second normalization
    # (1 / (1e-9 + colsum)) is applied once at finalize to the (C, N)
    # accumulator, so the doubly-normalized (N, N) matrix is never built.
    xr_acc[...] += jnp.dot(v_t.astype(jnp.bfloat16),
                           attn.astype(jnp.bfloat16),
                           preferred_element_type=jnp.float32)            # (C, N)
    col_acc[...] += jnp.sum(attn, axis=0, keepdims=True)                  # (1, N)

    @pl.when(t == n_t - 1)
    def _finalize():
        inv_col = pl.reciprocal(col_acc[...] + 1e-9, approx=True)         # (1, N)
        x_full = x_ref[0]                                                 # (C, N)
        x_r = xr_acc[...] * inv_col                                       # (C, N)
        y = jnp.dot(wt_ref[...].astype(jnp.bfloat16),
                    (x_full - x_r).astype(jnp.bfloat16),
                    preferred_element_type=jnp.float32) + bt_ref[...]     # (C, N)
        y_ref[0] = y.astype(y_ref.dtype)
        # Per-batch per-channel partial stats for the BatchNorm pass.
        ysum_ref[0] = jnp.sum(y, axis=-1, keepdims=True)                  # (C, 1)
        ysq_ref[0] = jnp.sum(y * y, axis=-1, keepdims=True)               # (C, 1)


def _bn_relu_residual_kernel(ysum_ref, ysq_ref, x_ref, y_ref, out_ref, *, count):
    # Combine the tiny per-batch stats into training-mode batch statistics
    # (biased variance, gamma=1, beta=0, eps=1e-5).  Recomputing this per grid
    # step costs O(B*C) and keeps the kernel a single streaming pass over y.
    total = jnp.sum(ysum_ref[...], axis=0)                                # (C, 1)
    total_sq = jnp.sum(ysq_ref[...], axis=0)                              # (C, 1)
    mean = total * (1.0 / count)
    var = total_sq * (1.0 / count) - mean * mean
    inv_std = jax.lax.rsqrt(var + 1e-5)                                   # (C, 1)

    y = y_ref[0]                                                          # (C, TN)
    y_hat = (y - mean) * inv_std
    out_ref[0] = (x_ref[0] + jnp.maximum(y_hat, 0.0)).astype(out_ref.dtype)


def _pick_tile(n, candidates=(512, 256, 128)):
    for t in candidates:
        if n % t == 0:
            return t
    return n


def offset_attention_forward(x, wq, wv, bv, wt, bt, *, tq=None, tn=None):
    B, C, N = x.shape
    Cq = wq.shape[0]

    if tq is None:
        tq = _pick_tile(N)
    if tn is None:
        tn = _pick_tile(N)
    assert N % tq == 0 and N % tn == 0, "N must be divisible by the chosen tiles"
    n_qt = N // tq

    y, ysum, ysq = pl.pallas_call(
        functools.partial(_attn_kernel, tq=tq),
        out_shape=(
            jax.ShapeDtypeStruct((B, C, N), x.dtype),      # y = trans_conv(x - x_r)
            jax.ShapeDtypeStruct((B, C, 1), jnp.float32),  # per-batch sum_n y
            jax.ShapeDtypeStruct((B, C, 1), jnp.float32),  # per-batch sum_n y^2
        ),
        grid_spec=pltpu.PrefetchScalarGridSpec(
            num_scalar_prefetch=0,
            grid=(B, n_qt),
            in_specs=[
                pl.BlockSpec((1, C, N), lambda b, t: (b, 0, 0)),   # x (resident per batch)
                pl.BlockSpec((Cq, C), lambda b, t: (0, 0)),        # wq (== wk, shared)
                pl.BlockSpec((C, C), lambda b, t: (0, 0)),         # wv
                pl.BlockSpec((C, 1), lambda b, t: (0, 0)),         # bv
                pl.BlockSpec((C, C), lambda b, t: (0, 0)),         # wt
                pl.BlockSpec((C, 1), lambda b, t: (0, 0)),         # bt
            ],
            out_specs=[
                pl.BlockSpec((1, C, N), lambda b, t: (b, 0, 0)),
                pl.BlockSpec((1, C, 1), lambda b, t: (b, 0, 0)),
                pl.BlockSpec((1, C, 1), lambda b, t: (b, 0, 0)),
            ],
            scratch_shapes=[
                pltpu.VMEM((Cq, N), jnp.bfloat16),   # shared q/k projection
                pltpu.VMEM((C, N), jnp.float32),     # x_r accumulator
                pltpu.VMEM((1, N), jnp.float32),     # column-sum accumulator
            ],
        ),
        compiler_params=pltpu.CompilerParams(
            dimension_semantics=("parallel", "arbitrary")),
    )(x, wq, wv, bv, wt, bt)

    out = pl.pallas_call(
        functools.partial(_bn_relu_residual_kernel, count=float(B * N)),
        out_shape=jax.ShapeDtypeStruct((B, C, N), x.dtype),
        grid_spec=pltpu.PrefetchScalarGridSpec(
            num_scalar_prefetch=0,
            grid=(B, N // tn),
            in_specs=[
                pl.BlockSpec((B, C, 1), lambda b, j: (0, 0, 0)),   # per-batch sums
                pl.BlockSpec((B, C, 1), lambda b, j: (0, 0, 0)),   # per-batch sumsq
                pl.BlockSpec((1, C, tn), lambda b, j: (b, 0, j)),  # x tile
                pl.BlockSpec((1, C, tn), lambda b, j: (b, 0, j)),  # y tile
            ],
            out_specs=pl.BlockSpec((1, C, tn), lambda b, j: (b, 0, j)),
        ),
        compiler_params=pltpu.CompilerParams(
            dimension_semantics=("parallel", "parallel")),
    )(ysum, ysq, x, y)
    return out


def reference_forward(x, wq, wv, bv, wt, bt, *, matmul_dtype=jnp.float32):
    """Pure-JAX reference of the PyTorch forward.

    matmul_dtype=jnp.bfloat16 mimics the kernel's bf16 MXU inputs (accumulation,
    softmax, normalizations and BatchNorm stay in f32)."""
    md = matmul_dtype

    def ee(spec, a, b):
        return jnp.einsum(spec, a.astype(md), b.astype(md),
                          preferred_element_type=jnp.float32)

    q = ee('oc,bcn->bon', wq, x)                          # shared q/k weight
    v = ee('oc,bcn->bon', wv, x) + bv[None]
    energy = ee('bcn,bcm->bnm', q, q)
    attn = jax.nn.softmax(energy, axis=-1)
    attn = attn / (1e-9 + jnp.sum(attn, axis=1, keepdims=True))
    x_r = ee('bcn,bnm->bcm', v, attn)
    y = ee('oc,bcn->bon', wt, x - x_r) + bt[None]
    mean = jnp.mean(y, axis=(0, 2), keepdims=True)
    var = jnp.mean((y - mean) ** 2, axis=(0, 2), keepdims=True)
    y_hat = (y - mean) / jnp.sqrt(var + 1e-5)
    return x + jnp.maximum(y_hat, 0.0)


if __name__ == "__main__":
    # channels divisible by 4; N a multiple of 128 so every block is lane-dense.
    B, C, N = 2, 64, 256
    Cq = C // 4

    key = jax.random.PRNGKey(0)
    kx, kq, kv, kbv, kt, kbt = jax.random.split(key, 6)

    x = jax.random.normal(kx, (B, C, N), dtype=jnp.float32)
    # deterministic synthetic parameters (roughly Conv1d-style fan-in scaling)
    wq = jax.random.normal(kq, (Cq, C), dtype=jnp.float32) / jnp.sqrt(C)
    wv = jax.random.normal(kv, (C, C), dtype=jnp.float32) / jnp.sqrt(C)
    bv = jax.random.normal(kbv, (C, 1), dtype=jnp.float32) * 0.1
    wt = jax.random.normal(kt, (C, C), dtype=jnp.float32) / jnp.sqrt(C)
    bt = jax.random.normal(kbt, (C, 1), dtype=jnp.float32) * 0.1

    # tq=128 so the grid exercises the multi-tile accumulate + finalize path.
    out = jax.block_until_ready(
        offset_attention_forward(x, wq, wv, bv, wt, bt, tq=128, tn=128))
    assert out.shape == (B, C, N)

    # Primary check: against a reference using the same bf16 matmul inputs.
    ref_bf16 = jax.block_until_ready(
        reference_forward(x, wq, wv, bv, wt, bt, matmul_dtype=jnp.bfloat16))
    err_bf16 = float(jnp.max(jnp.abs(out - ref_bf16)))
    assert jnp.allclose(out, ref_bf16, rtol=2e-2, atol=2e-2), (
        f"max abs err vs bf16-matmul reference = {err_bf16}")

    # Sanity check: full-f32 reference (difference is pure bf16-MXU noise).
    ref_f32 = jax.block_until_ready(reference_forward(x, wq, wv, bv, wt, bt))
    err_f32 = float(jnp.max(jnp.abs(out - ref_f32)))
    assert err_f32 < 0.5, f"semantic sanity check vs f32 reference failed: {err_f32}"

    print("KERNEL_OK")
</pallas_src>

<mosaic_0001>
module attributes {stable_mosaic.version = 11 : i64} {
  func.func @_attn_kernel(%arg0: i32, %arg1: i32, %arg2: memref<1x64x256xf32, #tpu.memory_space<vmem>>, %arg3: memref<16x64xf32, #tpu.memory_space<vmem>>, %arg4: memref<64x64xf32, #tpu.memory_space<vmem>>, %arg5: memref<64x1xf32, #tpu.memory_space<vmem>>, %arg6: memref<64x64xf32, #tpu.memory_space<vmem>>, %arg7: memref<64x1xf32, #tpu.memory_space<vmem>>, %arg8: memref<1x64x256xf32, #tpu.memory_space<vmem>>, %arg9: memref<1x64x1xf32, #tpu.memory_space<vmem>>, %arg10: memref<1x64x1xf32, #tpu.memory_space<vmem>>, %arg11: memref<16x256xbf16, #tpu.memory_space<vmem>>, %arg12: memref<64x256xf32, #tpu.memory_space<vmem>>, %arg13: memref<1x256xf32, #tpu.memory_space<vmem>>) attributes {dimension_semantics = [#tpu.dimension_semantics<parallel>, #tpu.dimension_semantics<arbitrary>], iteration_bounds = array<i64: 2, 2>, scalar_prefetch = 0 : i64, scratch_operands = 3 : i64, tpu.core_type = #tpu.core_type<tc>, window_params = [{transform_indices = @transform_0, window_bounds = array<i64: 1, 64, 256>}, {pipeline_mode = #tpu.pipeline_mode<synchronous>, transform_indices = @transform_1, window_bounds = array<i64: 16, 64>}, {pipeline_mode = #tpu.pipeline_mode<synchronous>, transform_indices = @transform_2, window_bounds = array<i64: 64, 64>}, {pipeline_mode = #tpu.pipeline_mode<synchronous>, transform_indices = @transform_3, window_bounds = array<i64: 64, 1>}, {pipeline_mode = #tpu.pipeline_mode<synchronous>, transform_indices = @transform_4, window_bounds = array<i64: 64, 64>}, {pipeline_mode = #tpu.pipeline_mode<synchronous>, transform_indices = @transform_5, window_bounds = array<i64: 64, 1>}, {transform_indices = @transform_6, window_bounds = array<i64: 1, 64, 256>}, {transform_indices = @transform_7, window_bounds = array<i64: 1, 64, 1>}, {transform_indices = @transform_8, window_bounds = array<i64: 1, 64, 1>}]} {
    %c0_i32 = arith.constant 0 : i32
    %0 = arith.cmpi eq, %arg1, %c0_i32 : i32
    %1 = arith.extui %0 : i1 to i32
    %c0_i32_0 = arith.constant 0 : i32
    %2 = arith.cmpi ne, %1, %c0_i32_0 : i32
    scf.if %2 {
      %c0_23 = arith.constant 0 : index
      %c0_24 = arith.constant 0 : index
      %c0_25 = arith.constant 0 : index
      %43 = vector.load %arg2[%c0_23, %c0_24, %c0_25] : memref<1x64x256xf32, #tpu.memory_space<vmem>>, vector<1x64x256xf32>
      %44 = vector.shape_cast %43 : vector<1x64x256xf32> to vector<64x256xf32>
      %45 = arith.truncf %44 : vector<64x256xf32> to vector<64x256xbf16>
      %c0_26 = arith.constant 0 : index
      %c0_27 = arith.constant 0 : index
      %46 = vector.load %arg3[%c0_26, %c0_27] : memref<16x64xf32, #tpu.memory_space<vmem>>, vector<16x64xf32>
      %47 = arith.truncf %46 : vector<16x64xf32> to vector<16x64xbf16>
      %cst_28 = arith.constant dense<0.000000e+00> : vector<16x256xf32>
      %48 = tpu.matmul %47, %45, %cst_28 {dimension_numbers = #tpu.dot_dimension_numbers<[1], [0], [0], [1], [0, 0, 1, 1], [], []>} : vector<16x64xbf16>, vector<64x256xbf16>, vector<16x256xf32> -> vector<16x256xf32>
      %49 = arith.truncf %48 : vector<16x256xf32> to vector<16x256xbf16>
      %c0_29 = arith.constant 0 : index
      %c0_30 = arith.constant 0 : index
      %50 = vector.load %arg11[%c0_29, %c0_30] : memref<16x256xbf16, #tpu.memory_space<vmem>>, vector<16x256xbf16>
      tpu.vector_store %arg11[%c0_29, %c0_30], %49 {strides = array<i32>} : memref<16x256xbf16, #tpu.memory_space<vmem>>, vector<16x256xbf16>,
      %cst_31 = arith.constant 0.000000e+00 : f32
      %51 = vector.broadcast %cst_31 : f32 to vector<64x256xf32>
      %c0_32 = arith.constant 0 : index
      %c0_33 = arith.constant 0 : index
      %52 = vector.load %arg12[%c0_32, %c0_33] : memref<64x256xf32, #tpu.memory_space<vmem>>, vector<64x256xf32>
      tpu.vector_store %arg12[%c0_32, %c0_33], %51 {strides = array<i32>} : memref<64x256xf32, #tpu.memory_space<vmem>>, vector<64x256xf32>,
      %cst_34 = arith.constant 0.000000e+00 : f32
      %53 = vector.broadcast %cst_34 : f32 to vector<1x256xf32>
      %c0_35 = arith.constant 0 : index
      %c0_36 = arith.constant 0 : index
      %54 = vector.load %arg13[%c0_35, %c0_36] : memref<1x256xf32, #tpu.memory_space<vmem>>, vector<1x256xf32>
      tpu.vector_store %arg13[%c0_35, %c0_36], %53 {strides = array<i32>} : memref<1x256xf32, #tpu.memory_space<vmem>>, vector<1x256xf32>,
    } else {
    }
    %c128_i32 = arith.constant 128 : i32
    %3 = arith.muli %arg1, %c128_i32 : i32
    %4 = tpu.assume_multiple %3, 128 : i32
    %c0 = arith.constant 0 : index
    %c0_1 = arith.constant 0 : index
    %5 = arith.index_cast %4 : i32 to index
    %6 = vector.load %arg2[%c0, %c0_1, %5] : memref<1x64x256xf32, #tpu.memory_space<vmem>>, vector<1x64x128xf32>
    %7 = vector.shape_cast %6 : vector<1x64x128xf32> to vector<64x128xf32>
    %c0_2 = arith.constant 0 : index
    %8 = arith.index_cast %4 : i32 to index
    %9 = vector.load %arg11[%c0_2, %8] : memref<16x256xbf16, #tpu.memory_space<vmem>>, vector<16x128xbf16>
    %c0_3 = arith.constant 0 : index
    %c0_4 = arith.constant 0 : index
    %10 = vector.load %arg11[%c0_3, %c0_4] : memref<16x256xbf16, #tpu.memory_space<vmem>>, vector<16x256xbf16>
    %cst = arith.constant dense<0.000000e+00> : vector<128x256xf32>
    %11 = tpu.matmul %9, %10, %cst {dimension_numbers = #tpu.dot_dimension_numbers<[0], [0], [1], [1], [0, 1, 1, 1], [], []>} : vector<16x128xbf16>, vector<16x256xbf16>, vector<128x256xf32> -> vector<128x256xf32>
    %cst_5 = arith.constant dense<0xFF800000> : vector<128xf32>
    %12 = vector.multi_reduction <maximumf>, %11, %cst_5 [1] : vector<128x256xf32> to vector<128xf32>
    %13 = vector.shape_cast %12 : vector<128xf32> to vector<128x1xf32>
    %14 = vector.broadcast %13 : vector<128x1xf32> to vector<128x256xf32>
    %15 = arith.subf %11, %14 : vector<128x256xf32>
    %16 = math.exp %15 : vector<128x256xf32>
    %cst_6 = arith.constant dense<0.000000e+00> : vector<128xf32>
    %17 = vector.multi_reduction <add>, %16, %cst_6 [1] : vector<128x256xf32> to vector<128xf32>
    %18 = vector.shape_cast %17 : vector<128xf32> to vector<128x1xf32>
    %19 = tpu.reciprocal %18 {approx = true} : vector<128x1xf32> -> vector<128x1xf32>
    %20 = vector.broadcast %19 : vector<128x1xf32> to vector<128x256xf32>
    %21 = arith.mulf %16, %20 : vector<128x256xf32>
    %c0_7 = arith.constant 0 : index
    %c0_8 = arith.constant 0 : index
    %22 = vector.load %arg4[%c0_7, %c0_8] : memref<64x64xf32, #tpu.memory_space<vmem>>, vector<64x64xf32>
    %23 = arith.truncf %22 : vector<64x64xf32> to vector<64x64xbf16>
    %24 = arith.truncf %7 : vector<64x128xf32> to vector<64x128xbf16>
    %cst_9 = arith.constant dense<0.000000e+00> : vector<64x128xf32>
    %25 = tpu.matmul %23, %24, %cst_9 {dimension_numbers = #tpu.dot_dimension_numbers<[1], [0], [0], [1], [0, 0, 1, 1], [], []>} : vector<64x64xbf16>, vector<64x128xbf16>, vector<64x128xf32> -> vector<64x128xf32>
    %c0_10 = arith.constant 0 : index
    %c0_11 = arith.constant 0 : index
    %26 = vector.load %arg5[%c0_10, %c0_11] : memref<64x1xf32, #tpu.memory_space<vmem>>, vector<64x1xf32>
    %27 = vector.broadcast %26 : vector<64x1xf32> to vector<64x128xf32>
    %28 = arith.addf %25, %27 : vector<64x128xf32>
    %c0_12 = arith.constant 0 : index
    %c0_13 = arith.constant 0 : index
    %29 = vector.load %arg12[%c0_12, %c0_13] : memref<64x256xf32, #tpu.memory_space<vmem>>, vector<64x256xf32>
    %30 = arith.truncf %28 : vector<64x128xf32> to vector<64x128xbf16>
    %31 = arith.truncf %21 : vector<128x256xf32> to vector<128x256xbf16>
    %cst_14 = arith.constant dense<0.000000e+00> : vector<64x256xf32>
    %32 = tpu.matmul %30, %31, %cst_14 {dimension_numbers = #tpu.dot_dimension_numbers<[1], [0], [0], [1], [0, 0, 1, 1], [], []>} : vector<64x128xbf16>, vector<128x256xbf16>, vector<64x256xf32> -> vector<64x256xf32>
    %33 = arith.addf %29, %32 : vector<64x256xf32>
    %c0_15 = arith.constant 0 : index
    %c0_16 = arith.constant 0 : index
    %34 = vector.load %arg12[%c0_15, %c0_16] : memref<64x256xf32, #tpu.memory_space<vmem>>, vector<64x256xf32>
    tpu.vector_store %arg12[%c0_15, %c0_16], %33 {strides = array<i32>} : memref<64x256xf32, #tpu.memory_space<vmem>>, vector<64x256xf32>,
    %c0_17 = arith.constant 0 : index
    %c0_18 = arith.constant 0 : index
    %35 = vector.load %arg13[%c0_17, %c0_18] : memref<1x256xf32, #tpu.memory_space<vmem>>, vector<1x256xf32>
    %cst_19 = arith.constant dense<0.000000e+00> : vector<256xf32>
    %36 = vector.multi_reduction <add>, %21, %cst_19 [0] : vector<128x256xf32> to vector<256xf32>
    %37 = vector.shape_cast %36 : vector<256xf32> to vector<1x256xf32>
    %38 = arith.addf %35, %37 : vector<1x256xf32>
    %c0_20 = arith.constant 0 : index
    %c0_21 = arith.constant 0 : index
    %39 = vector.load %arg13[%c0_20, %c0_21] : memref<1x256xf32, #tpu.memory_space<vmem>>, vector<1x256xf32>
    tpu.vector_store %arg13[%c0_20, %c0_21], %38 {strides = array<i32>} : memref<1x256xf32, #tpu.memory_space<vmem>>, vector<1x256xf32>,
    %c1_i32 = arith.constant 1 : i32
    %40 = arith.cmpi eq, %arg1, %c1_i32 : i32
    %41 = arith.extui %40 : i1 to i32
    %c0_i32_22 = arith.constant 0 : i32
    %42 = arith.cmpi ne, %41, %c0_i32_22 : i32
    scf.if %42 {
      %c0_23 = arith.constant 0 : index
      %c0_24 = arith.constant 0 : index
      %43 = vector.load %arg13[%c0_23, %c0_24] : memref<1x256xf32, #tpu.memory_space<vmem>>, vector<1x256xf32>
      %cst_25 = arith.constant 9.99999971E-10 : f32
      %44 = vector.broadcast %cst_25 : f32 to vector<1x256xf32>
      %45 = arith.addf %43, %44 : vector<1x256xf32>
      %46 = tpu.reciprocal %45 {approx = true} : vector<1x256xf32> -> vector<1x256xf32>
      %c0_26 = arith.constant 0 : index
      %c0_27 = arith.constant 0 : index
      %c0_28 = arith.constant 0 : index
      %47 = vector.load %arg2[%c0_26, %c0_27, %c0_28] : memref<1x64x256xf32, #tpu.memory_space<vmem>>, vector<1x64x256xf32>
      %48 = vector.shape_cast %47 : vector<1x64x256xf32> to vector<64x256xf32>
      %c0_29 = arith.constant 0 : index
      %c0_30 = arith.constant 0 : index
      %49 = vector.load %arg12[%c0_29, %c0_30] : memref<64x256xf32, #tpu.memory_space<vmem>>, vector<64x256xf32>
      %50 = vector.broadcast %46 : vector<1x256xf32> to vector<64x256xf32>
      %51 = arith.mulf %49, %50 : vector<64x256xf32>
      %c0_31 = arith.constant 0 : index
      %c0_32 = arith.constant 0 : index
      %52 = vector.load %arg6[%c0_31, %c0_32] : memref<64x64xf32, #tpu.memory_space<vmem>>, vector<64x64xf32>
      %53 = arith.truncf %52 : vector<64x64xf32> to vector<64x64xbf16>
      %54 = arith.subf %48, %51 : vector<64x256xf32>
      %55 = arith.truncf %54 : vector<64x256xf32> to vector<64x256xbf16>
      %cst_33 = arith.constant dense<0.000000e+00> : vector<64x256xf32>
      %56 = tpu.matmul %53, %55, %cst_33 {dimension_numbers = #tpu.dot_dimension_numbers<[1], [0], [0], [1], [0, 0, 1, 1], [], []>} : vector<64x64xbf16>, vector<64x256xbf16>, vector<64x256xf32> -> vector<64x256xf32>
      %c0_34 = arith.constant 0 : index
      %c0_35 = arith.constant 0 : index
      %57 = vector.load %arg7[%c0_34, %c0_35] : memref<64x1xf32, #tpu.memory_space<vmem>>, vector<64x1xf32>
      %58 = vector.broadcast %57 : vector<64x1xf32> to vector<64x256xf32>
      %59 = arith.addf %56, %58 : vector<64x256xf32>
      %c0_36 = arith.constant 0 : index
      %c0_37 = arith.constant 0 : index
      %c0_38 = arith.constant 0 : index
      %60 = vector.load %arg8[%c0_36, %c0_37, %c0_38] : memref<1x64x256xf32, #tpu.memory_space<vmem>>, vector<1x64x256xf32>
      %61 = vector.shape_cast %60 : vector<1x64x256xf32> to vector<64x256xf32>
      %62 = vector.shape_cast %59 : vector<64x256xf32> to vector<1x64x256xf32>
      tpu.vector_store %arg8[%c0_36, %c0_37, %c0_38], %62 {strides = array<i32>} : memref<1x64x256xf32, #tpu.memory_space<vmem>>, vector<1x64x256xf32>,
      %cst_39 = arith.constant dense<0.000000e+00> : vector<64xf32>
      %63 = vector.multi_reduction <add>, %59, %cst_39 [1] : vector<64x256xf32> to vector<64xf32>
      %64 = vector.shape_cast %63 : vector<64xf32> to vector<64x1xf32>
      %c0_40 = arith.constant 0 : index
      %c0_41 = arith.constant 0 : index
      %c0_42 = arith.constant 0 : index
      %65 = vector.load %arg9[%c0_40, %c0_41, %c0_42] : memref<1x64x1xf32, #tpu.memory_space<vmem>>, vector<1x64x1xf32>
      %66 = vector.shape_cast %65 : vector<1x64x1xf32> to vector<64x1xf32>
      %67 = vector.shape_cast %64 : vector<64x1xf32> to vector<1x64x1xf32>
      tpu.vector_store %arg9[%c0_40, %c0_41, %c0_42], %67 {strides = array<i32>} : memref<1x64x1xf32, #tpu.memory_space<vmem>>, vector<1x64x1xf32>,
      %68 = arith.mulf %59, %59 : vector<64x256xf32>
      %cst_43 = arith.constant dense<0.000000e+00> : vector<64xf32>
      %69 = vector.multi_reduction <add>, %68, %cst_43 [1] : vector<64x256xf32> to vector<64xf32>
      %70 = vector.shape_cast %69 : vector<64xf32> to vector<64x1xf32>
      %c0_44 = arith.constant 0 : index
      %c0_45 = arith.constant 0 : index
      %c0_46 = arith.constant 0 : index
      %71 = vector.load %arg10[%c0_44, %c0_45, %c0_46] : memref<1x64x1xf32, #tpu.memory_space<vmem>>, vector<1x64x1xf32>
      %72 = vector.shape_cast %71 : vector<1x64x1xf32> to vector<64x1xf32>
      %73 = vector.shape_cast %70 : vector<64x1xf32> to vector<1x64x1xf32>
      tpu.vector_store %arg10[%c0_44, %c0_45, %c0_46], %73 {strides = array<i32>} : memref<1x64x1xf32, #tpu.memory_space<vmem>>, vector<1x64x1xf32>,
    } else {
    }
    return
  }
  func.func @transform_0(%arg0: i32, %arg1: i32) -> (i32, i32, i32) {
    %c0_i32 = arith.constant 0 : i32
    %c0_i32_0 = arith.constant 0 : i32
    %c0_i32_1 = arith.constant 0 : i32
    return %arg0, %c0_i32, %c0_i32_0 : i32, i32, i32
  }
  func.func @transform_1(%arg0: i32, %arg1: i32) -> (i32, i32) {
    %c0_i32 = arith.constant 0 : i32
    %c0_i32_0 = arith.constant 0 : i32
    %c0_i32_1 = arith.constant 0 : i32
    return %c0_i32, %c0_i32_0 : i32, i32
  }
  func.func @transform_2(%arg0: i32, %arg1: i32) -> (i32, i32) {
    %c0_i32 = arith.constant 0 : i32
    %c0_i32_0 = arith.constant 0 : i32
    %c0_i32_1 = arith.constant 0 : i32
    return %c0_i32, %c0_i32_0 : i32, i32
  }
  func.func @transform_3(%arg0: i32, %arg1: i32) -> (i32, i32) {
    %c0_i32 = arith.constant 0 : i32
    %c0_i32_0 = arith.constant 0 : i32
    %c0_i32_1 = arith.constant 0 : i32
    return %c0_i32, %c0_i32_0 : i32, i32
  }
  func.func @transform_4(%arg0: i32, %arg1: i32) -> (i32, i32) {
    %c0_i32 = arith.constant 0 : i32
    %c0_i32_0 = arith.constant 0 : i32
    %c0_i32_1 = arith.constant 0 : i32
    return %c0_i32, %c0_i32_0 : i32, i32
  }
  func.func @transform_5(%arg0: i32, %arg1: i32) -> (i32, i32) {
    %c0_i32 = arith.constant 0 : i32
    %c0_i32_0 = arith.constant 0 : i32
    %c0_i32_1 = arith.constant 0 : i32
    return %c0_i32, %c0_i32_0 : i32, i32
  }
  func.func @transform_6(%arg0: i32, %arg1: i32) -> (i32, i32, i32) {
    %c0_i32 = arith.constant 0 : i32
    %c0_i32_0 = arith.constant 0 : i32
    %c0_i32_1 = arith.constant 0 : i32
    return %arg0, %c0_i32, %c0_i32_0 : i32, i32, i32
  }
  func.func @transform_7(%arg0: i32, %arg1: i32) -> (i32, i32, i32) {
    %c0_i32 = arith.constant 0 : i32
    %c0_i32_0 = arith.constant 0 : i32
    %c0_i32_1 = arith.constant 0 : i32
    return %arg0, %c0_i32, %c0_i32_0 : i32, i32, i32
  }
  func.func @transform_8(%arg0: i32, %arg1: i32) -> (i32, i32, i32) {
    %c0_i32 = arith.constant 0 : i32
    %c0_i32_0 = arith.constant 0 : i32
    %c0_i32_1 = arith.constant 0 : i32
    return %arg0, %c0_i32, %c0_i32_0 : i32, i32, i32
  }
}

</mosaic_0001>

<bundles_post_ra>
// kernel: tpu_custom_call.1
= control target key start
LH: loop header
LB: loop body
LE: loop exit
PB: predicated region body
PF: predicated region fallthrough
CT: control target
= control target key end

     0   :  { %s2953_s0 = inlined_call_operand.hbm [shape: f32[2,64,256], index: 0, kind: input, shape index: {}]   ;;  %s2954_s1 = inlined_call_operand.hbm [shape: f32[16,64], index: 1, kind: input, shape index: {}]   ;;  %s2955_s2 = inlined_call_operand.vmem [shape: f32[64,64], index: 2, kind: input, shape index: {}]   ;;  %s2956_s3 = inlined_call_operand.vmem [shape: f32[64,1], index: 3, kind: input, shape index: {}]   ;;  %s2957_s4 = inlined_call_operand.vmem [shape: f32[64,64], index: 4, kind: input, shape index: {}]   ;;  %s2958_s5 = inlined_call_operand.vmem [shape: f32[64,1], index: 5, kind: input, shape index: {}]   ;;  %s2959_s6 = inlined_call_operand.hbm [shape: f32[2,64,256], index: 6, kind: output, shape index: {0}]   ;;  %s2960_s7 = inlined_call_operand.vmem [shape: f32[2,64,1], index: 7, kind: output, shape index: {1}]   ;;  %s2961_s8 = inlined_call_operand.vmem [shape: f32[2,64,1], index: 8, kind: output, shape index: {2}]  }
   0x1   :  { %2970 = sst [smem:[#allocation19_spill]] %s2954_s1 }
   0x2   :  { %2971 = sst [smem:[#allocation20_spill]] %s2957_s4 }
   0x3   :  { %2972 = sst [smem:[#allocation21_spill]] %s2958_s5 }
   0x4   :  { %2973 = sst [smem:[#allocation22_spill]] %s2959_s6 }
   0x5   :  { %14 = vsyncpa [#allocation6], 0 }
   0x6   :  { %16 = vsyncpa [#allocation6 + $0x1], 0 }
   0x7   :  { %17 = vsyncpa [#allocation9], 0 }
   0x8   :  { %18 = vsyncpa [#allocation7], 0 }
   0x9   :  { %20 = vsyncpa [#allocation7 + $0x1], 0  ;;  %s2169_s27 = smov 0   ;;  %s2171_s28 = smov 0  }
   0xa   :  { %s2173_s29 = smov 0   ;;  %s2175_s30 = smov 0  }
   0xb   :  { %s2177_s9 = smov 0   ;;  %s2179_s10 = smov 0  }
   0xc   :  { %s2181_s11 = smov 0   ;;  %s2183_s12 = smov 0  }
   0xd LB: > { %2974 = sst [smem:[#allocation14_spill]] %s2084_s27  ;;  %s1661_s13 = sadd.s32 4294967295, %s2112_s12   ;;  %s2112_s12 = sphi %s2183_s12, %s26_s12   ;;  %s2108_s11 = sphi %s2181_s11, %s3000_s11   ;;  %s2104_s10 = sphi %s2179_s10, %s2995_s10   ;;  %s2100_s9 = sphi %s2177_s9, %s2999_s9   ;;  %s2096_s30 = sphi %s2175_s30, %s2994_s30   ;;  %s2092_s29 = sphi %s2173_s29, %s2998_s29   ;;  %s2088_s28 = sphi %s2171_s28, %s2997_s28   ;;  %s2084_s27 = sphi %s2169_s27, %s2996_s27  }
   0xe   : > { %2975 = sst [smem:[#allocation15_spill]] %s2104_s10  ;;  %s1662_s14 = sadd.s32 4294967294, %s2112_s12  }
   0xf   : > { %p58_p0 = scmp.ne.s32.totalorder %s2088_s28, %s2084_s27  ;;  %p2213_p1 = scmp.eq.s32.totalorder %s1661_s13, 0 }
  0x10   : > { %p2217_p2 = scmp.eq.s32.totalorder %s1661_s13, 3  ;;  %p193_p3 = scmp.eq.s32.totalorder %s1662_s14, 3 }
  0x11   : > { %p2223_p4 = por %p2213_p1, %p58_p0  ;;  %p1663_p5 = scmp.ge.s32.totalorder %s2112_s12, 1 }
  0x12   : > { %p2228_p6 = por %p193_p3, %p58_p0  ;;  %p252_p7 = scmp.lt.s32.totalorder %s2112_s12, 5 }
  0x13   : > { %s2981_s1 = sld [smem:[#allocation19_spill]]  ;;  %s2114_s23 = smov [#allocation8]  }
  0x14   : > { %s2979_s18 = scalar_select %p2228_p6, 1, 0 }
  0x15   : > { %p2236_p8 = pnand %p1663_p5, %p252_p7  ;;  %s265_s24 = sshll.u32 %s2114_s23, 4  ;;  %s266_s24 = int_to_ptr.vmem [resolvable:$true] %s265_s24 }
  0x16   : > { %2980 = sst [smem:[#allocation16_spill]] %s2979_s18  ;;  %s2115_s25 = smov 128  }
  0x17   : > { %p1756_p9 = pneg %p2236_p8  ;;  %s2116_s26 = smov 8  }
  0x18   : > { %s35_s13 = sadd.s32 1, %s2104_s10  ;;  %s38_s14 = sadd.s32 1, %s2108_s11 }
  0x19   : > { %s263_s21 = sshll.u32 %s2981_s1, 4  ;;  %p1757_p10 = pnand %p1756_p9, %p2213_p1  ;;  %s264_s21 = int_to_ptr.hbm [resolvable:$true] %s263_s21 }
  0x1a   : > { %p36_p11 = scmp.ge.s32.totalorder %s35_s13, 2  ;;  %s45_s19 = sadd.s32 1, %s2092_s29 }
  0x1b   : > { %1759 = dma.hbm_to_vmem [thread:$0]  (!%p1757_p10), %s264_s21, 256, %s266_s24, [#allocation9], %s2115_s25, %s2115_s25, %s2116_s26  }
  0x1c   : > { %p52_p12 = scmp.ne.s32.totalorder %s2092_s29, %s2088_s28  ;;  %s3002_s13 = smov (%p36_p11, %s35_s13), 0 }
  0x1d   : > { %2983 = sst [smem:[#allocation17_spill]] %s3002_s13  ;;  %s3004_s14 = smov (!%p36_p11, %s38_s14), %s2108_s11 }
  0x1e   : > { %p53_p13 = scmp.eq.s32.totalorder %s2112_s12, 0  ;;  %p2255_p0 = por %p2217_p2, %p52_p12 }
  0x1f   : > { %p40_p3 = scmp.ge.s32.totalorder %s3004_s14, 2  ;;  %p1769_p5 = scmp.lt.s32.totalorder %s2112_s12, 4 }
  0x20   : > { %s2984_s20 = scalar_select %p2255_p0, 1, 0 }
  0x21   : > { %p2260_p7 = por %p53_p13, %p52_p12  ;;  %s291_s23 = sand.u32 1, %s2092_s29  }
  0x22   : > { %2985 = sst [smem:[#allocation18_spill]] %s2984_s20  ;;  %s3006_s14 = smov (%p40_p3, %s3004_s14), 0 }
  0x23   : > { %s1666_s24 = sshll.u32 %s291_s23, 7  ;;  %s42_s25 = ssub.s32 %s2108_s11, %s3006_s14 }
  0x24   : > { %p43_p9 = scmp.eq.s32.totalorder %s42_s25, 0  ;;  %s1729_s16 = sshll.u32 %s2108_s11, 7 }
  0x25   : > { %s300_s13 = scalar_lea.hbm %s2953_s0, %s1729_s16  ;;  %s295_s10 = scalar_lea.vmem [#allocation5], %s1666_s24 }
  0x26   : > { %s303_s18 = sshll.u32 %s295_s10, 4  ;;  %s301_s6 = sshll.u32 %s300_s13, 4  ;;  %s304_s18 = int_to_ptr.vmem [resolvable:$true] %s303_s18  ;;  %s302_s6 = int_to_ptr.hbm [resolvable:$true] %s301_s6 }
  0x27   : > { %s2274_s27 = scalar_select %p43_p9, %s2092_s29, %s45_s19  }
  0x28   : > { %p1761_p2 = pnand %p1769_p5, %p2260_p7  ;;  %s292_s20 = scalar_lea.sflag [#allocation6], %s291_s23 }
  0x29   : > { %s2117_s4 = smov 256   ;;  %s2118_s5 = smov 16  }
  0x2a   : > { %1763 = dma.hbm_to_vmem [thread:$0]  (!%p1761_p2), %s302_s6, 2048, %s304_s18, %s292_s20, %s2117_s4, %s2117_s4, %s2118_s5  }
  0x2b   : > { %315 = sbr.rel (%p2236_p8) target bundleno = 1558 (0x616), region = 44  ;;  %s2283_s1 = sand.u32 (!%p2236_p8), 1, %s2088_s28  }
  0x2c   : > { %s1670_s10 = sshll.u32 (!%p2236_p8), %s2283_s1, 7  ;;  %s318_s13 = scalar_lea.sflag (!%p2236_p8), [#allocation6], %s2283_s1 }
  0x2d   : > { %s2287_s19 = scalar_lea.vmem (!%p2236_p8), [#allocation5], %s1670_s10 }
  0x30   : > { %2071 = dma.done.wait (%p2223_p4), %s318_s13, 2048  }
  0x31   : > { %2073 = vsyncadd (%p2223_p4), %s318_s13, 4294965248 }
  0x32   : > { %2075 = dma.done.wait (%p2213_p1), [#allocation9], 256  }
  0x33   : > { %2077 = vsyncadd (%p2213_p1), [#allocation9], 4294967040  ;;  %p370_p8 = scmp.lt.s32.totalorder %s2100_s9, 1  ;;  %s2309_s23 = scalar_lea.vmem [#allocation10], %s1670_s10 }
  0x34   : > { %p1677_p4 = scmp.ne.s32.totalorder %s2096_s30, 0 }
  0x35   : > { %s371_s4 = scalar_select %p370_p8, %s2100_s9, 1 }
  0x36   : > { %384 = sbr.rel (%p1677_p4) target bundleno = 215 (0xd7), region = 56 }
  0x37   : > { %s1730_s5 = sshll.u32 %s371_s4, 6 }
  0x38   : > { %s2302_s22 = scalar_lea.vmem %s2960_s7, %s1730_s5  ;;  %s2307_s17 = scalar_lea.vmem %s2961_s8, %s1730_s5 }
  0x3b   : > { %v397_v0 = vld [vmem:[%s2287_s19 + $0x60] sm:$0xff]  ;;  %v399_v1 = vld [vmem:[%s2287_s19 + $0x70] sm:$0xff]  ;;  %v398_v2 = vld [vmem:[%s2287_s19 + $0x68] sm:$0xff]  ;;  %vm412_vm0 = vcmask 523264   ;;  %v2119_v27 = vmov 0.0   ;;  %v464_v28 = vlaneseq }
  0x3c   : > { %v407_v3 = vpack.c.bf16 %v399_v1, %v397_v0  ;;  %v400_v4 = vld [vmem:[%s2287_s19 + $0x78] sm:$0xff]  ;;  %v393_v5 = vld [vmem:[%s2287_s19 + $0x40] sm:$0xff]  ;;  %v395_v6 = vld [vmem:[%s2287_s19 + $0x50] sm:$0xff]  ;;  %448 = vst [vmem:[#allocation3 + $0x30] sm:$0xff] %v2119_v27 }
  0x3d   : > { %v408_v7 = vpack.c.bf16 %v400_v4, %v398_v2  ;;  %v394_v8 = vld [vmem:[%s2287_s19 + $0x48] sm:$0xff]  ;;  %v396_v9 = vld [vmem:[%s2287_s19 + $0x58] sm:$0xff]  ;;  %v405_v10 = vpack.c.bf16 %v395_v6, %v393_v5  ;;  %v389_v12 = vld [vmem:[%s2287_s19 + $0x20] sm:$0xff]  ;;  %449 = vst [vmem:[#allocation3] sm:$0xff] %v2119_v27  ;;  %vm466_vm1 = vcmp.lt.s32.totalorder %v464_v28, 256 }
  0x3e   : > { %420 = vmatpush.bf16.msra.mxu0 %v407_v3  ;;  %v406_v11 = vpack.c.bf16 %v396_v9, %v394_v8  ;;  %v391_v13 = vld [vmem:[%s2287_s19 + $0x30] sm:$0xff]  ;;  %v390_v14 = vld [vmem:[%s2287_s19 + $0x28] sm:$0xff]  ;;  %v392_v15 = vld [vmem:[%s2287_s19 + $0x38] sm:$0xff]  ;;  %450 = vst [vmem:[#allocation3 + $0x58] sm:$0xff] %v2119_v27 }
  0x3f   : > { %434 = vmatpush.bf16.msra.mxu1 %v408_v7  ;;  %v403_v16 = vpack.c.bf16 %v391_v13, %v389_v12  ;;  %v404_v17 = vpack.c.bf16 %v392_v15, %v390_v14  ;;  %v385_v18 = vld [vmem:[%s2287_s19] sm:$0xff]  ;;  %v387_v19 = vld [vmem:[%s2287_s19 + $0x10] sm:$0xff]  ;;  %v386_v20 = vld [vmem:[%s2287_s19 + $0x8] sm:$0xff]  ;;  %451 = vst [vmem:[#allocation3 + $0x18] sm:$0xff] %v2119_v27 }
  0x40   : > { %v388_v21 = vld [vmem:[%s2287_s19 + $0x18] sm:$0xff]  ;;  %v401_v22 = vpack.c.bf16 %v387_v19, %v385_v18  ;;  %v409_v23 = vld [vmem:[#allocation8] sm:$0xff]  ;;  %v410_v24 = vld [vmem:[#allocation8 + $0x8] sm:$0xff]  ;;  %452 = vst [vmem:[#allocation3 + $0x50] sm:$0xff] %v2119_v27 }
  0x41   : > { %v402_v25 = vpack.c.bf16 %v388_v21, %v386_v20  ;;  %v411_v26 = vpack.c.bf16 %v410_v24, %v409_v23  ;;  %453 = vst [vmem:[#allocation3 + $0x68] sm:$0xff] %v2119_v27 }
  0x42   : > { %421 = vmatpush.bf16.msra.mxu0 %v405_v10  ;;  %454 = vst [vmem:[#allocation3 + $0x8] sm:$0xff] %v2119_v27 }
  0x43   : > { %435 = vmatpush.bf16.msra.mxu1 %v406_v11  ;;  %455 = vst [vmem:[#allocation3 + $0x48] sm:$0xff] %v2119_v27 }
  0x44   : > { %456 = vst [vmem:[#allocation3 + $0x40] sm:$0xff] %v2119_v27 }
  0x45   : > { %457 = vst [vmem:[#allocation3 + $0x20] sm:$0xff] %v2119_v27 }
  0x46   : > { %422 = vmatpush.bf16.msra.mxu0 %v403_v16  ;;  %458 = vst [vmem:[#allocation3 + $0x10] sm:$0xff] %v2119_v27 }
  0x47   : > { %436 = vmatpush.bf16.msra.mxu1 %v404_v17  ;;  %459 = vst [vmem:[#allocation3 + $0x38] sm:$0xff] %v2119_v27 }
  0x48   : > { %460 = vst [vmem:[#allocation3 + $0x60] sm:$0xff] %v2119_v27 }
  0x49   : > { %461 = vst [vmem:[#allocation3 + $0x70] sm:$0xff] %v2119_v27 }
  0x4a   : > { %423 = vmatpush.bf16.msra.mxu0 %v401_v22  ;;  %462 = vst [vmem:[#allocation3 + $0x78] sm:$0xff] %v2119_v27 }
  0x4b   : > { %437 = vmatpush.bf16.msra.mxu1 %v402_v25  ;;  %463 = vst [vmem:[#allocation3 + $0x28] sm:$0xff] %v2119_v27 }
  0x4c   : > { %468 = vst.msk [vmem:[#allocation4] sm:$0x3] %vm466_vm1, %v2119_v27 }
  0x4d   : > { %1678 = vmatmul.msk.bf16.vlgmr.msra.gmra.mxu0 %vm412_vm0, %v411_v26 }
  0x4e   : > { %1679 = vmatmul.msk.bf16.vlgmr.msra.gmra.mxu1 %vm412_vm0, %v411_v26 }
  0xca   : > { %v425_v29 = vpop.f32.mrf.mxu0 }
  0xcb   : > { %v439_v30 = vpop.f32.mrf.mxu1 }
  0xcc   : > { %v444_v31 = vpack.c.bf16 %v439_v30, %v425_v29 }
  0xce   : > { %446 = vst [vmem:[#allocation2] sm:$0xff] %v444_v31 }
  0xd2   : > { %v427_v32 = vpop.f32.mrf.mxu0 }
  0xd3   : > { %v441_v33 = vpop.f32.mrf.mxu1 }
  0xd4   : > { %v445_v34 = vpack.c.bf16 %v441_v33, %v427_v32 }
  0xd6   : > { %447 = vst [vmem:[#allocation2 + $0x8] sm:$0xff] %v445_v34 }
  0xd7 PF: > { %s1680_s15 = sshll.u32 %s2096_s30, 7  ;;  %v1689_v35 = vld [vmem:[#allocation2] sm:$0xf]  ;;  %v1733_v38 = vld [vmem:[#allocation2 + $0x4] sm:$0xf]  ;;  %vm520_vm2 = vcmask 130048  }
  0xd8   : > { %s2329_s24 = sshra.s32 %s1680_s15, 7  ;;  %vm947_vm3 = vcmask 523264   ;;  %vm1161_vm4 = vcmask 1040384   ;;  %p1715_p1 = scmp.ne.s32.totalorder %s2096_s30, 1 }
  0xd9   : > { %s1682_s25 = sshll.u32 %s2329_s24, 2  ;;  %s1681_s26 = sshll.u32 %s2329_s24, 3 }
  0xda   : > { %s483_s16 = scalar_lea.vmem [#allocation2], %s1682_s25  ;;  %s2506_s10 = scalar_lea.vmem %s2287_s19, %s1681_s26 [#allocation5] }
  0xdb   : > { %s2987_s24 = sld [smem:[#allocation21_spill]] (!%p1715_p1) }
  0xdc   : > { %s2988_s21 = sld [smem:[#allocation20_spill]] (!%p1715_p1) }
  0xdd   : > { %v1734_v36 = vld [vmem:[#allocation2 + $0x4] sm:$0xf0]  ;;  %v1691_v39 = vld [vmem:[#allocation2 + $0x8] sm:$0xf0]  ;;  %v1685_v41 = vld [vmem:[%s483_s16] sm:$0xf] }
  0xde   : > { %v1690_v37 = vor.u32 %v1734_v36, %v1689_v35  ;;  %v1694_v40 = vor.u32 %v1733_v38, %v1691_v39  ;;  %v1732_v42 = vld [vmem:[%s483_s16 + $0x4] sm:$0xf0] }
  0xdf   : > { %v1686_v43 = vor.u32 %v1732_v42, %v1685_v41 }
  0xe0   : > { %552 = vmatpush.bf16.msra.mxu0 %v1690_v37  ;;  %601 = vmatpush.bf16.msra.mxu1 %v1694_v40 }
  0xe1   : > { %494 = vxpose.xlu0.c.b16.start.end [1/1] (short) %v1686_v43, 128 }
 0x18d   : > { %v502_v44 = vpop.trf.xlu0 }
 0x18e   : > { %1695 = vmatmul.msk.bf16.vlgmr.msra.gmra.mxu0 %vm520_vm2, %v502_v44  ;;  %1703 = vmatmul.msk.bf16.vlgmr.msra.gmra.mxu1 %vm520_vm2, %v502_v44 }
 0x19d   : > { %v503_v45 = vpop.trf.xlu0 }
 0x19e   : > { %1696 = vmatmul.msk.bf16.gmra.mxu0 %vm520_vm2, %v503_v45  ;;  %1704 = vmatmul.msk.bf16.gmra.mxu1 %vm520_vm2, %v503_v45 }
 0x1ad   : > { %v504_v46 = vpop.trf.xlu0 }
 0x1ae   : > { %1697 = vmatmul.msk.bf16.gmra.mxu0 %vm520_vm2, %v504_v46  ;;  %1705 = vmatmul.msk.bf16.gmra.mxu1 %vm520_vm2, %v504_v46 }
 0x1bd   : > { %v505_v47 = vpop.trf.xlu0 }
 0x1be   : > { %1698 = vmatmul.msk.bf16.gmra.mxu0 %vm520_vm2, %v505_v47  ;;  %1706 = vmatmul.msk.bf16.gmra.mxu1 %vm520_vm2, %v505_v47 }
 0x1cd   : > { %v506_v48 = vpop.trf.xlu0 }
 0x1ce   : > { %1699 = vmatmul.msk.bf16.gmra.mxu0 %vm520_vm2, %v506_v48  ;;  %1707 = vmatmul.msk.bf16.gmra.mxu1 %vm520_vm2, %v506_v48 }
 0x1dd   : > { %v507_v49 = vpop.trf.xlu0 }
 0x1de   : > { %1700 = vmatmul.msk.bf16.gmra.mxu0 %vm520_vm2, %v507_v49  ;;  %1708 = vmatmul.msk.bf16.gmra.mxu1 %vm520_vm2, %v507_v49 }
 0x1ed   : > { %v508_v50 = vpop.trf.xlu0 }
 0x1ee   : > { %1701 = vmatmul.msk.bf16.gmra.mxu0 %vm520_vm2, %v508_v50  ;;  %1709 = vmatmul.msk.bf16.gmra.mxu1 %vm520_vm2, %v508_v50 }
 0x1fd   : > { %v509_v51 = vpop.trf.xlu0 }
 0x1fe   : > { %1702 = vmatmul.msk.bf16.gmra.mxu0 %vm520_vm2, %v509_v51  ;;  %1710 = vmatmul.msk.bf16.gmra.mxu1 %vm520_vm2, %v509_v51 }
 0x20b   : > { %v2348_v52 = vpop.f32.mrf.mxu0  ;;  %v2350_v53 = vpop.f32.mrf.mxu1 }
 0x20c   : > { %v643_v35 = vmax.f32 %v2348_v52, %v2350_v53 }
 0x213   : > { %v2352_v54 = vpop.f32.mrf.mxu0  ;;  %v2354_v55 = vpop.f32.mrf.mxu1 }
 0x214   : > { %v646_v30 = vmax.f32 %v2352_v54, %v2354_v55 }
 0x21b   : > { %v2356_v56 = vpop.f32.mrf.mxu0  ;;  %v2358_v57 = vpop.f32.mrf.mxu1 }
 0x21c   : > { %v649_v31 = vmax.f32 %v2356_v56, %v2358_v57 }
 0x223   : > { %v2360_v58 = vpop.f32.mrf.mxu0  ;;  %v2362_v59 = vpop.f32.mrf.mxu1 }
 0x224   : > { %v652_v28 = vmax.f32 %v2360_v58, %v2362_v59 }
 0x22b   : > { %v2364_v60 = vpop.f32.mrf.mxu0  ;;  %v2366_v61 = vpop.f32.mrf.mxu1 }
 0x22c   : > { %v655_v29 = vmax.f32 %v2364_v60, %v2366_v61 }
 0x233   : > { %v2368_v62 = vpop.f32.mrf.mxu0  ;;  %v2370_v63 = vpop.f32.mrf.mxu1 }
 0x234   : > { %v658_v26 = vmax.f32 %v2368_v62, %v2370_v63 }
 0x23b   : > { %v2372_v0 = vpop.f32.mrf.mxu0  ;;  %v2374_v1 = vpop.f32.mrf.mxu1 }
 0x23c   : > { %v661_v27 = vmax.f32 %v2372_v0, %v2374_v1 }
 0x243   : > { %v2376_v2 = vpop.f32.mrf.mxu0  ;;  %v2378_v3 = vpop.f32.mrf.mxu1 }
 0x244   : > { %v664_v24 = vmax.f32 %v2376_v2, %v2378_v3 }
 0x24b   : > { %v2380_v4 = vpop.f32.mrf.mxu0  ;;  %v2382_v5 = vpop.f32.mrf.mxu1 }
 0x24c   : > { %v667_v25 = vmax.f32 %v2380_v4, %v2382_v5 }
 0x253   : > { %v2384_v6 = vpop.f32.mrf.mxu0  ;;  %v2386_v7 = vpop.f32.mrf.mxu1 }
 0x254   : > { %v670_v21 = vmax.f32 %v2384_v6, %v2386_v7 }
 0x25b   : > { %v2388_v8 = vpop.f32.mrf.mxu0  ;;  %v2390_v9 = vpop.f32.mrf.mxu1 }
 0x25c   : > { %v673_v22 = vmax.f32 %v2388_v8, %v2390_v9 }
 0x263   : > { %v2392_v10 = vpop.f32.mrf.mxu0  ;;  %v2394_v11 = vpop.f32.mrf.mxu1 }
 0x264   : > { %v676_v17 = vmax.f32 %v2392_v10, %v2394_v11 }
 0x26b   : > { %v2396_v12 = vpop.f32.mrf.mxu0  ;;  %v2398_v13 = vpop.f32.mrf.mxu1 }
 0x26c   : > { %v679_v14 = vmax.f32 %v2396_v12, %v2398_v13 }
 0x26e   : > { %680 = vmax.xlane.f32.xlu1 %v679_v14 }
 0x273   : > { %v2402_v15 = vpop.f32.mrf.mxu0  ;;  %v2404_v16 = vpop.f32.mrf.mxu1 }
 0x274   : > { %v682_v18 = vmax.f32 %v2402_v15, %v2404_v16 }
 0x276   : > { %677 = vmax.xlane.f32.xlu1 %v676_v17  ;;  %683 = vmax.xlane.f32.xlu2 %v682_v18 }
 0x27b   : > { %v2410_v19 = vpop.f32.mrf.mxu0  ;;  %v2412_v20 = vpop.f32.mrf.mxu1 }
 0x27c   : > { %v685_v23 = vmax.f32 %v2410_v19, %v2412_v20 }
 0x27e   : > { %671 = vmax.xlane.f32.xlu1 %v670_v21  ;;  %674 = vmax.xlane.f32.xlu2 %v673_v22 }
 0x27f   : > { %686 = vmax.xlane.f32.xlu0 %v685_v23 }
 0x283   : > { %v2436_v32 = vpop.f32.mrf.mxu0  ;;  %v2438_v33 = vpop.f32.mrf.mxu1 }
 0x284   : > { %v688_v34 = vmax.f32 %v2436_v32, %v2438_v33 }
 0x286   : > { %665 = vmax.xlane.f32.xlu1 %v664_v24  ;;  %668 = vmax.xlane.f32.xlu2 %v667_v25 }
 0x28e   : > { %659 = vmax.xlane.f32.xlu1 %v658_v26  ;;  %662 = vmax.xlane.f32.xlu2 %v661_v27 }
 0x296   : > { %653 = vmax.xlane.f32.xlu1 %v652_v28  ;;  %656 = vmax.xlane.f32.xlu2 %v655_v29 }
 0x29e   : > { %647 = vmax.xlane.f32.xlu1 %v646_v30  ;;  %650 = vmax.xlane.f32.xlu2 %v649_v31 }
 0x2a6   : > { %644 = vmax.xlane.f32.xlu2 %v643_v35  ;;  %689 = vmax.xlane.f32.xlu1 %v688_v34 }
 0x2e1   : > { %v2444_v36 = vpop.xlane.xlu1 %680 }
 0x2e9   : > { %v2446_v37 = vpop.xlane.xlu1 %677  ;;  %v2448_v38 = vpop.xlane.xlu2 %683 }
 0x2f1   : > { %v2450_v39 = vpop.xlane.xlu1 %671  ;;  %v2452_v40 = vpop.xlane.xlu2 %674 }
 0x2f9   : > { %v666_v41 = vpop.xlane.xlu1 %665  ;;  %v2454_v42 = vpop.xlane.xlu2 %668 }
 0x2fa   : > { %v706_v35 = vsub.f32 %v2378_v3, %v666_v41 }
 0x2fc   : > { %v753_v3 = vmul.f32 1.442695, %v706_v35  ;;  %v476_v35 = vld [vmem:[%s2506_s10 + $0x20] sm:$0xff] }
 0x301   : > { %v660_v43 = vpop.xlane.xlu1 %659  ;;  %v2456_v44 = vpop.xlane.xlu2 %662 }
 0x302   : > { %v701_v24 = vsub.f32 %v2368_v62, %v660_v43 }
 0x304   : > { %v743_v30 = vmul.f32 1.442695, %v701_v24  ;;  %v480_v24 = vld [vmem:[%s2506_s10 + $0x60] sm:$0xff] }
 0x309   : > { %v654_v45 = vpop.xlane.xlu1 %653  ;;  %v657_v46 = vpop.xlane.xlu2 %656 }
 0x30a   : > { %v697_v51 = vsub.f32 %v2360_v58, %v654_v45  ;;  %v698_v18 = vsub.f32 %v2362_v59, %v654_v45 }
 0x30c   : > { %v735_v21 = vmul.f32 1.442695, %v697_v51  ;;  %v737_v22 = vmul.f32 1.442695, %v698_v18  ;;  %v703_v18 = vsub.f32 %v2372_v0, %v2456_v44 }
 0x311   : > { %v648_v47 = vpop.xlane.xlu1 %647  ;;  %v651_v48 = vpop.xlane.xlu2 %650 }
 0x312   : > { %v693_v49 = vsub.f32 %v2352_v54, %v648_v47  ;;  %v694_v50 = vsub.f32 %v2354_v55, %v648_v47  ;;  %v702_v54 = vsub.f32 %v2370_v63, %v660_v43  ;;  %v695_v58 = vsub.f32 %v2356_v56, %v651_v48 }
 0x313   : > { %v696_v29 = vsub.f32 %v2358_v57, %v651_v48  ;;  %v705_v56 = vsub.f32 %v2376_v2, %v666_v41  ;;  %v699_v43 = vsub.f32 %v2364_v60, %v657_v46  ;;  %v700_v47 = vsub.f32 %v2366_v61, %v657_v46 }
 0x314   : > { %v727_v14 = vmul.f32 1.442695, %v693_v49  ;;  %v729_v17 = vmul.f32 1.442695, %v694_v50  ;;  %v731_v62 = vmul.f32 1.442695, %v695_v58  ;;  %v709_v61 = vsub.f32 %v2384_v6, %v2450_v39 }
 0x315   : > { %v733_v63 = vmul.f32 1.442695, %v696_v29  ;;  %v751_v48 = vmul.f32 1.442695, %v705_v56  ;;  %v739_v50 = vmul.f32 1.442695, %v699_v43 }
 0x316   : > { %1849 = vpow2.f32 %v727_v14  ;;  %v741_v51 = vmul.f32 1.442695, %v700_v47  ;;  %v759_v6 = vmul.f32 1.442695, %v709_v61  ;;  %v479_v58 = vld [vmem:[%s2506_s10 + $0x50] sm:$0xff] }
 0x317   : > { %1851 = vpow2.f32 %v729_v17  ;;  %v710_v17 = vsub.f32 %v2386_v7, %v2450_v39  ;;  %v477_v43 = vld [vmem:[%s2506_s10 + $0x30] sm:$0xff] }
 0x318   : > { %1853 = vpow2.f32 %v735_v21  ;;  %v704_v21 = vsub.f32 %v2374_v1, %v2456_v44 }
 0x319   : > { %v645_v23 = vpop.xlane.xlu2 %644  ;;  %1855 = vpow2.f32 %v737_v22  ;;  %v761_v39 = vmul.f32 1.442695, %v710_v17  ;;  %v883_v17 = vld [vmem:[%s2955_s2] sm:$0xff] }
 0x31a   : > { %v691_v25 = vsub.f32 %v2348_v52, %v645_v23  ;;  %v692_v26 = vsub.f32 %v2350_v53, %v645_v23  ;;  %v745_v53 = vmul.f32 1.442695, %v702_v54  ;;  %v747_v23 = vmul.f32 1.442695, %v703_v18  ;;  %v884_v18 = vld [vmem:[%s2955_s2 + $0x8] sm:$0xff] }
 0x31b   : > { %v749_v1 = vmul.f32 1.442695, %v704_v21  ;;  %v712_v21 = vsub.f32 %v2390_v9, %v2452_v40  ;;  %v887_v9 = vld [vmem:[%s2955_s2 + $0x20] sm:$0xff] }
 0x31c   : > { %v2466_v55 = vpop.eup %1849  ;;  %v723_v27 = vmul.f32 1.442695, %v691_v25  ;;  %v725_v59 = vmul.f32 1.442695, %v692_v26  ;;  %v481_v25 = vld [vmem:[%s2506_s10 + $0x70] sm:$0xff]  ;;  %v478_v26 = vld [vmem:[%s2506_s10 + $0x40] sm:$0xff] }
 0x31d   : > { %v2469_v28 = vpop.eup %1851  ;;  %v898_v44 = vpack.c.bf16 %v481_v25, %v480_v24  ;;  %v765_v24 = vmul.f32 1.442695, %v712_v21  ;;  %v690_v25 = vpop.xlane.xlu1 %689 }
 0x31e   : > { %1857 = vpow2.f32 %v723_v27  ;;  %v790_v52 = vadd.f32 %v2469_v28, %v2466_v55  ;;  %v2474_v31 = vpop.eup %1853 }
 0x31f   : > { %1859 = vpow2.f32 %v725_v59  ;;  %v2477_v34 = vpop.eup %1855  ;;  %v713_v59 = vsub.f32 %v2392_v10, %v2446_v37  ;;  %964 = vmatpush.bf16.msra.mxu2 %v898_v44  ;;  %1736 = vmatpush.bf16.msra.mxu3 %v898_v44  ;;  %v708_v10 = vsub.f32 %v2382_v5, %v2454_v42  ;;  %v474_v5 = vld [vmem:[%s2506_s10] sm:$0xff] }
 0x320   : > { %791 = vadd.xlane.f32.xlu1 %v790_v52  ;;  %1861 = vpow2.f32 %v743_v30  ;;  %v796_v49 = vadd.f32 %v2477_v34, %v2474_v31  ;;  %v714_v30 = vsub.f32 %v2394_v11, %v2446_v37  ;;  %v897_v52 = vpack.c.bf16 %v479_v58, %v478_v26 }
 0x321   : > { %1863 = vpow2.f32 %v745_v53  ;;  %v707_v53 = vsub.f32 %v2380_v4, %v2454_v42  ;;  %v757_v47 = vmul.f32 1.442695, %v708_v10  ;;  %v715_v58 = vsub.f32 %v2396_v12, %v2444_v36 }
 0x322   : > { %1865 = vpow2.f32 %v731_v62  ;;  %v767_v62 = vmul.f32 1.442695, %v713_v59 }
 0x323   : > { %1867 = vpow2.f32 %v733_v63  ;;  %v769_v63 = vmul.f32 1.442695, %v714_v30  ;;  %965 = vmatpush.bf16.msra.mxu2 %v897_v52  ;;  %1737 = vmatpush.bf16.msra.mxu3 %v897_v52  ;;  %v755_v4 = vmul.f32 1.442695, %v707_v53  ;;  %v716_v30 = vsub.f32 %v2398_v13, %v2444_v36 }
 0x324   : > { %v2480_v57 = vpop.eup %1857  ;;  %1869 = vpow2.f32 %v751_v48  ;;  %v896_v48 = vpack.c.bf16 %v477_v43, %v476_v35  ;;  %v721_v52 = vsub.f32 %v2436_v32, %v690_v25  ;;  %v722_v53 = vsub.f32 %v2438_v33, %v690_v25  ;;  %v885_v35 = vld [vmem:[%s2955_s2 + $0x10] sm:$0xff]  ;;  %v886_v43 = vld [vmem:[%s2955_s2 + $0x18] sm:$0xff] }
 0x325   : > { %v2483_v45 = vpop.eup %1859  ;;  %1871 = vpow2.f32 %v753_v3  ;;  %v717_v3 = vsub.f32 %v2402_v15, %v2448_v38  ;;  %v711_v15 = vsub.f32 %v2388_v8, %v2452_v40  ;;  %v888_v40 = vld [vmem:[%s2955_s2 + $0x28] sm:$0xff]  ;;  %v771_v10 = vmul.f32 1.442695, %v715_v58  ;;  %v901_v25 = vld [vmem:[%s2956_s3 + $0x10] sm:$0xff] }
 0x326   : > { %v787_v2 = vadd.f32 %v2483_v45, %v2480_v57  ;;  %v2490_v41 = vpop.eup %1861  ;;  %1873 = vpow2.f32 %v739_v50  ;;  %v893_v26 = vpack.c.bf16 %v888_v40, %v887_v9  ;;  %v783_v13 = vmul.f32 1.442695, %v721_v52  ;;  %v900_v9 = vld [vmem:[%s2956_s3 + $0x8] sm:$0xff]  ;;  %v899_v40 = vld [vmem:[%s2956_s3] sm:$0xff]  ;;  %v906_v52 = vld [vmem:[%s2956_s3 + $0x38] sm:$0xff] }
 0x327   : > { %v2492_v60 = vpop.eup %1863  ;;  %1875 = vpow2.f32 %v741_v51  ;;  %v718_v51 = vsub.f32 %v2404_v16, %v2448_v38  ;;  %966 = vmatpush.bf16.msra.mxu2 %v896_v48  ;;  %1738 = vmatpush.bf16.msra.mxu3 %v896_v48  ;;  %v775_v16 = vmul.f32 1.442695, %v717_v3  ;;  %v763_v8 = vmul.f32 1.442695, %v711_v15  ;;  %v890_v48 = vld [vmem:[%s2955_s2 + $0x38] sm:$0xff]  ;;  %v904_v58 = vld [vmem:[%s2956_s3 + $0x28] sm:$0xff] }
 0x328   : > { %788 = vadd.xlane.f32.xlu2 %v787_v2  ;;  %797 = vadd.xlane.f32.xlu1 %v796_v49  ;;  %v2494_v14 = vpop.eup %1865  ;;  %v802_v7 = vadd.f32 %v2492_v60, %v2490_v41  ;;  %1877 = vpow2.f32 %v759_v6  ;;  %v475_v2 = vld [vmem:[%s2506_s10 + $0x10] sm:$0xff]  ;;  %v785_v32 = vmul.f32 1.442695, %v722_v53 }
 0x329   : > { %v2499_v46 = vpop.eup %1867  ;;  %1879 = vpow2.f32 %v761_v39  ;;  %v895_v61 = vpack.c.bf16 %v475_v2, %v474_v5 }
 0x32a   : > { %v793_v22 = vadd.f32 %v2499_v46, %v2494_v14  ;;  %v2514_v0 = vpop.eup %1869  ;;  %1881 = vpow2.f32 %v747_v23 }
 0x32b   : > { %v2519_v54 = vpop.eup %1871  ;;  %1883 = vpow2.f32 %v749_v1  ;;  %967 = vmatpush.bf16.msra.mxu2 %v895_v61  ;;  %1739 = vmatpush.bf16.msra.mxu3 %v895_v61  ;;  %v2120_v1 = vmov 0   ;;  %v892_v61 = vpack.c.bf16 %v886_v43, %v885_v35 }
 0x32c   : > { %v2522_v27 = vpop.eup %1873  ;;  %v808_v37 = vadd.f32 %v2519_v54, %v2514_v0  ;;  %1885 = vpow2.f32 %v767_v62  ;;  %1847 = vset.pattern.permute.xlu1 %v2120_v1  ;;  %1846 = vset.pattern.permute.xlu2 %v2120_v1 }
 0x32d   : > { %v2526_v29 = vpop.eup %1875  ;;  %1887 = vpow2.f32 %v769_v63  ;;  %1848 = vset.pattern.permute.xlu0 %v2120_v1  ;;  %v687_v63 = vpop.xlane.xlu0 %686  ;;  %v902_v1 = vld [vmem:[%s2956_s3 + $0x18] sm:$0xff] }
 0x32e   : > { %v799_v11 = vadd.f32 %v2526_v29, %v2522_v27  ;;  %v2538_v56 = vpop.eup %1877  ;;  %1889 = vpow2.f32 %v755_v4  ;;  %1713 = vmatmul.msk.bf16.vlgmr.msra.gmra.mxu3 %vm947_vm3, %v893_v26  ;;  %v719_v5 = vsub.f32 %v2410_v19, %v687_v63  ;;  %v720_v2 = vsub.f32 %v2412_v20, %v687_v63  ;;  %v905_v26 = vld [vmem:[%s2956_s3 + $0x30] sm:$0xff] }
 0x32f   : > { %v2543_v42 = vpop.eup %1879  ;;  %1891 = vpow2.f32 %v757_v47  ;;  %v889_v47 = vld [vmem:[%s2955_s2 + $0x30] sm:$0xff] }
 0x330   : > { %794 = vadd.xlane.f32.xlu2 %v793_v22  ;;  %803 = vadd.xlane.f32.xlu1 %v802_v7  ;;  %v2546_v49 = vpop.eup %1881  ;;  %v814_v6 = vadd.f32 %v2543_v42, %v2538_v56  ;;  %v891_v22 = vpack.c.bf16 %v884_v18, %v883_v17  ;;  %v777_v7 = vmul.f32 1.442695, %v718_v51  ;;  %1893 = vpow2.f32 %v775_v16 }
 0x331   : > { %v2550_v50 = vpop.eup %1883  ;;  %v894_v19 = vpack.c.bf16 %v890_v48, %v889_v47  ;;  %v779_v18 = vmul.f32 1.442695, %v719_v5  ;;  %v781_v21 = vmul.f32 1.442695, %v720_v2 }
 0x332   : > { %v805_v38 = vadd.f32 %v2550_v50, %v2546_v49  ;;  %v2568_v39 = vpop.eup %1885  ;;  %1711 = vmatmul.msk.bf16.vlgmr.msra.gmra.mxu2 %vm947_vm3, %v891_v22  ;;  %1895 = vpow2.f32 %v777_v7 }
 0x333   : > { %v2576_v23 = vpop.eup %1887  ;;  %1897 = vpow2.f32 %v763_v8 }
 0x334   : > { %v2578_v44 = vpop.eup %1889  ;;  %1899 = vpow2.f32 %v765_v24  ;;  %v820_v62 = vadd.f32 %v2576_v23, %v2568_v39  ;;  %v903_v24 = vld [vmem:[%s2956_s3 + $0x20] sm:$0xff] }
 0x335   : > { %v2583_v59 = vpop.eup %1891  ;;  %1901 = vpow2.f32 %v771_v10 }
 0x336   : > { %v811_v12 = vadd.f32 %v2583_v59, %v2578_v44 }
 0x338   : > { %800 = vadd.xlane.f32.xlu2 %v799_v11  ;;  %809 = vadd.xlane.f32.xlu1 %v808_v37  ;;  %v773_v11 = vmul.f32 1.442695, %v716_v30  ;;  %v2594_v37 = vpop.eup %1893 }
 0x339   : > { %v2596_v36 = vpop.eup %1895 }
 0x33a   : > { %v2598_v4 = vpop.eup %1897  ;;  %1903 = vpow2.f32 %v773_v11  ;;  %v826_v51 = vadd.f32 %v2596_v36, %v2594_v37 }
 0x33b   : > { %v2600_v33 = vpop.eup %1899  ;;  %1905 = vpow2.f32 %v783_v13 }
 0x33c   : > { %1907 = vpow2.f32 %v785_v32  ;;  %v817_v3 = vadd.f32 %v2600_v33, %v2598_v4  ;;  %v2620_v17 = vpop.eup %1901 }
 0x33d   : > { %1909 = vpow2.f32 %v779_v18 }
 0x33e   : > { %1714 = vmatmul.msk.bf16.gmra.mxu3 %vm947_vm3, %v894_v19  ;;  %1911 = vpow2.f32 %v781_v21 }
 0x340   : > { %806 = vadd.xlane.f32.xlu2 %v805_v38  ;;  %815 = vadd.xlane.f32.xlu1 %v814_v6  ;;  %v2622_v15 = vpop.eup %1903 }
 0x341   : > { %v2624_v16 = vpop.eup %1905  ;;  %v823_v38 = vadd.f32 %v2622_v15, %v2620_v17 }
 0x342   : > { %1712 = vmatmul.msk.bf16.gmra.mxu2 %vm947_vm3, %v892_v61  ;;  %v2627_v20 = vpop.eup %1907 }
 0x343   : > { %v832_v6 = vadd.f32 %v2627_v20, %v2624_v16  ;;  %v2634_v22 = vpop.eup %1909 }
 0x344   : > { %v2636_v7 = vpop.eup %1911 }
 0x345   : > { %v829_v8 = vadd.f32 %v2636_v7, %v2634_v22 }
 0x348   : > { %812 = vadd.xlane.f32.xlu2 %v811_v12  ;;  %821 = vadd.xlane.f32.xlu1 %v820_v62 }
 0x350   : > { %818 = vadd.xlane.f32.xlu2 %v817_v3  ;;  %827 = vadd.xlane.f32.xlu1 %v826_v51 }
 0x358   : > { %824 = vadd.xlane.f32.xlu2 %v823_v38  ;;  %833 = vadd.xlane.f32.xlu1 %v832_v6 }
 0x360   : > { %830 = vadd.xlane.f32.xlu2 %v829_v8 }
 0x371   : > { %914 = vperm.xlu1 %1847, %v900_v9  }
 0x378   : > { %909 = vperm.xlu2 %1846, %v899_v40  }
 0x379   : > { %929 = vperm.xlu1 %1847, %v903_v24  }
 0x380   : > { %919 = vperm.xlu2 %1846, %v901_v25  }
 0x381   : > { %939 = vperm.xlu1 %1847, %v905_v26  }
 0x388   : > { %924 = vperm.xlu2 %1846, %v902_v1  }
 0x390   : > { %934 = vperm.xlu2 %1846, %v904_v58  }
 0x393   : > { %v792_v30 = vpop.xlane.xlu1 %791 }
 0x398   : > { %944 = vperm.xlu2 %1846, %v906_v52  }
 0x39b   : > { %v789_v53 = vpop.xlane.xlu2 %788  ;;  %v798_v10 = vpop.xlane.xlu1 %797 }
 0x39c   : > { %1913 = vrcp.f32 %v789_v53 }
 0x39d   : > { %1915 = vrcp.f32 %v792_v30 }
 0x3a2   : > { %v1914_v63 = vpop.eup %1913 }
 0x3a3   : > { %v795_v12 = vpop.xlane.xlu2 %794  ;;  %v804_v62 = vpop.xlane.xlu1 %803  ;;  %v2665_v47 = vmul.f32 %v1914_v63, %v2480_v57  ;;  %v2668_v48 = vmul.f32 %v1914_v63, %v2483_v45 }
 0x3a4   : > { %1917 = vrcp.f32 %v795_v12  ;;  %v1916_v32 = vpop.eup %1915 }
 0x3a5   : > { %1919 = vrcp.f32 %v798_v10  ;;  %v2677_v51 = vmul.f32 %v1916_v32, %v2466_v55  ;;  %v2680_v61 = vmul.f32 %v1916_v32, %v2469_v28 }
 0x3a7   : > { %v1116_v57 = vadd.f32 %v2677_v51, %v2665_v47  ;;  %v1137_v45 = vadd.f32 %v2680_v61, %v2668_v48 }
 0x3aa   : > { %v1918_v35 = vpop.eup %1917 }
 0x3ab   : > { %v801_v11 = vpop.xlane.xlu2 %800  ;;  %v810_v13 = vpop.xlane.xlu1 %809  ;;  %v2671_v2 = vmul.f32 %v1918_v35, %v2494_v14  ;;  %v2674_v3 = vmul.f32 %v1918_v35, %v2499_v46 }
 0x3ac   : > { %1921 = vrcp.f32 %v801_v11  ;;  %v1920_v19 = vpop.eup %1919 }
 0x3ad   : > { %1923 = vrcp.f32 %v804_v62  ;;  %v1117_v14 = vadd.f32 %v1116_v57, %v2671_v2  ;;  %v1138_v46 = vadd.f32 %v1137_v45, %v2674_v3  ;;  %v2695_v6 = vmul.f32 %v1920_v19, %v2474_v31 }
 0x3ae   : > { %v2698_v8 = vmul.f32 %v1920_v19, %v2477_v34 }
 0x3af   : > { %v1118_v40 = vadd.f32 %v1117_v14, %v2695_v6 }
 0x3b0   : > { %v1139_v24 = vadd.f32 %v1138_v46, %v2698_v8 }
 0x3b2   : > { %v1922_v18 = vpop.eup %1921 }
 0x3b3   : > { %v807_v43 = vpop.xlane.xlu2 %806  ;;  %v816_v5 = vpop.xlane.xlu1 %815  ;;  %v2689_v38 = vmul.f32 %v1922_v18, %v2522_v27  ;;  %v2692_v28 = vmul.f32 %v1922_v18, %v2526_v29 }
 0x3b4   : > { %1925 = vrcp.f32 %v807_v43  ;;  %v1924_v9 = vpop.eup %1923 }
 0x3b5   : > { %1927 = vrcp.f32 %v810_v13  ;;  %v1119_v27 = vadd.f32 %v1118_v40, %v2689_v38  ;;  %v1140_v26 = vadd.f32 %v1139_v24, %v2692_v28  ;;  %v2711_v34 = vmul.f32 %v1924_v9, %v2490_v41 }
 0x3b6   : > { %v2714_v1 = vmul.f32 %v1924_v9, %v2492_v60 }
 0x3b7   : > { %v1120_v52 = vadd.f32 %v1119_v27, %v2711_v34 }
 0x3b8   : > { %v1141_v53 = vadd.f32 %v1140_v26, %v2714_v1 }
 0x3ba   : > { %v1926_v25 = vpop.eup %1925 }
 0x3bb   : > { %v813_v21 = vpop.xlane.xlu2 %812  ;;  %v822_v55 = vpop.xlane.xlu1 %821  ;;  %v2705_v29 = vmul.f32 %v1926_v25, %v2546_v49  ;;  %v2708_v31 = vmul.f32 %v1926_v25, %v2550_v50 }
 0x3bc   : > { %1929 = vrcp.f32 %v813_v21  ;;  %v1928_v58 = vpop.eup %1927 }
 0x3bd   : > { %1931 = vrcp.f32 %v816_v5  ;;  %v1121_v12 = vadd.f32 %v1120_v52, %v2705_v29  ;;  %v1142_v50 = vadd.f32 %v1141_v53, %v2708_v31  ;;  %v2727_v62 = vmul.f32 %v1928_v58, %v2514_v0 }
 0x3be   : > { %v2730_v11 = vmul.f32 %v1928_v58, %v2519_v54 }
 0x3bf   : > { %v1122_v63 = vadd.f32 %v1121_v12, %v2727_v62 }
 0x3c0   : > { %v1143_v32 = vadd.f32 %v1142_v50, %v2730_v11 }
 0x3c2   : > { %v1930_v10 = vpop.eup %1929 }
 0x3c3   : > { %v819_v30 = vpop.xlane.xlu2 %818  ;;  %v828_v49 = vpop.xlane.xlu1 %827  ;;  %v2721_v41 = vmul.f32 %v1930_v10, %v2578_v44  ;;  %v2724_v60 = vmul.f32 %v1930_v10, %v2583_v59 }
 0x3c4   : > { %1933 = vrcp.f32 %v819_v30  ;;  %v1932_v13 = vpop.eup %1931 }
 0x3c5   : > { %1935 = vrcp.f32 %v822_v55  ;;  %v1123_v44 = vadd.f32 %v1122_v63, %v2721_v41  ;;  %v1144_v5 = vadd.f32 %v1143_v32, %v2724_v60  ;;  %v869_v54 = vmul.f32 %v1932_v13, %v2538_v56 }
 0x3c6   : > { %v870_v19 = vmul.f32 %v1932_v13, %v2543_v42 }
 0x3c7   : > { %v1124_v45 = vadd.f32 %v1123_v44, %v869_v54 }
 0x3c8   : > { %v1145_v18 = vadd.f32 %v1144_v5, %v870_v19 }
 0x3ca   : > { %v1934_v35 = vpop.eup %1933 }
 0x3cb   : > { %v825_v43 = vpop.xlane.xlu2 %824  ;;  %v871_v59 = vmul.f32 %v1934_v35, %v2598_v4  ;;  %v872_v0 = vmul.f32 %v1934_v35, %v2600_v33  ;;  %v834_v57 = vpop.xlane.xlu1 %833 }
 0x3cc   : > { %1937 = vrcp.f32 %v825_v43  ;;  %v1936_v14 = vpop.eup %1935 }
 0x3cd   : > { %1939 = vrcp.f32 %v828_v49  ;;  %v1125_v46 = vadd.f32 %v1124_v45, %v871_v59  ;;  %v1146_v21 = vadd.f32 %v1145_v18, %v872_v0  ;;  %v873_v33 = vmul.f32 %v1936_v14, %v2568_v39  ;;  %v969_v45 = vpop.f32.mrf.mxu2 }
 0x3ce   : > { %1941 = vrcp.f32 %v834_v57  ;;  %v874_v56 = vmul.f32 %v1936_v14, %v2576_v23 }
 0x3cf   : > { %v1126_v42 = vadd.f32 %v1125_v46, %v873_v33  ;;  %v1019_v44 = vpack.c.bf16 %v873_v33, %v871_v59  ;;  %v1017_v46 = vpack.c.bf16 %v869_v54, %v2721_v41  ;;  %v1015_v59 = vpack.c.bf16 %v2727_v62, %v2705_v29 }
 0x3d0   : > { %v1147_v24 = vadd.f32 %v1146_v21, %v874_v56  ;;  %v1018_v21 = vpack.c.bf16 %v870_v19, %v2724_v60  ;;  %v1013_v19 = vpack.c.bf16 %v2711_v34, %v2689_v38  ;;  %v1012_v62 = vpack.c.bf16 %v2698_v8, %v2674_v3  ;;  %v979_v3 = vpop.f32.mrf.mxu3 }
 0x3d1   : > { %v1009_v38 = vpack.c.bf16 %v2677_v51, %v2665_v47 }
 0x3d2   : > { %v1938_v55 = vpop.eup %1937 }
 0x3d3   : > { %v831_v9 = vpop.xlane.xlu2 %830  ;;  %v875_v40 = vmul.f32 %v1938_v55, %v2620_v17  ;;  %v876_v4 = vmul.f32 %v1938_v55, %v2622_v15  ;;  %v1940_v25 = vpop.eup %1939 }
 0x3d4   : > { %1943 = vrcp.f32 %v831_v9  ;;  %v1942_v27 = vpop.eup %1941  ;;  %v877_v30 = vmul.f32 %v1940_v25, %v2594_v37  ;;  %v878_v52 = vmul.f32 %v1940_v25, %v2596_v36 }
 0x3d5   : > { %v1127_v26 = vadd.f32 %v1126_v42, %v875_v40  ;;  %v1148_v58 = vadd.f32 %v1147_v24, %v876_v4  ;;  %v881_v17 = vmul.f32 %v1942_v27, %v2624_v16  ;;  %v882_v15 = vmul.f32 %v1942_v27, %v2627_v20  ;;  %v971_v54 = vpop.f32.mrf.mxu2 }
 0x3d6   : > { %v1021_v36 = vpack.c.bf16 %v877_v30, %v875_v40  ;;  %v1022_v35 = vpack.c.bf16 %v878_v52, %v876_v4  ;;  %v1165_v4 = vlaneseq  ;;  %v1014_v24 = vpack.c.bf16 %v2714_v1, %v2692_v28 }
 0x3d7   : > { %v1128_v10 = vadd.f32 %v1127_v26, %v877_v30  ;;  %v1149_v49 = vadd.f32 %v1148_v58, %v878_v52  ;;  %v1010_v28 = vpack.c.bf16 %v2680_v61, %v2668_v48 }
 0x3d8   : > { %vm1167_vm5 = vcmp.lt.s32.totalorder %v1165_v4, 256  ;;  %v981_v52 = vpop.f32.mrf.mxu3 }
 0x3da   : > { %v1944_v53 = vpop.eup %1943 }
 0x3db   : > { %v879_v39 = vmul.f32 %v1944_v53, %v2634_v22  ;;  %v880_v23 = vmul.f32 %v1944_v53, %v2636_v7  ;;  %v1020_v7 = vpack.c.bf16 %v874_v56, %v872_v0  ;;  %v1016_v0 = vpack.c.bf16 %v2730_v11, %v2708_v31  ;;  %v1115_v56 = vld [vmem:[#allocation4] sm:$0x3]  ;;  %v910_v29 = vpop.permute.xlu2 %909 }
 0x3dc   : > { %v1011_v31 = vpack.c.bf16 %v2695_v6, %v2671_v2  ;;  %v970_v25 = vadd.f32 %v969_v45, %v910_v29 }
 0x3dd   : > { %v1023_v12 = vpack.c.bf16 %v881_v17, %v879_v39  ;;  %v1024_v50 = vpack.c.bf16 %v882_v15, %v880_v23  ;;  %v1129_v13 = vadd.f32 %v1128_v10, %v879_v39  ;;  %v1150_v63 = vadd.f32 %v1149_v49, %v880_v23  ;;  %v974_v34 = vpop.f32.mrf.mxu2 }
 0x3df   : > { %1025 = vmatpush.bf16.msrb.mxu3 %v1023_v12  ;;  %1054 = vmatpush.bf16.msrb.mxu2 %v1024_v50  ;;  %v1130_v37 = vadd.f32 %v1129_v13, %v881_v17  ;;  %v1151_v32 = vadd.f32 %v1150_v63, %v882_v15  ;;  %v989_v50 = vld [vmem:[#allocation3 + $0x30] sm:$0xff]  ;;  %v990_v13 = vld [vmem:[#allocation3] sm:$0xff] }
 0x3e0   : > { %v984_v61 = vpop.f32.mrf.mxu3 }
 0x3e1   : > { %v1131_v43 = vrot.slane %v1130_v37, 4  ;;  %v1152_v16 = vrot.slane %v1151_v32, 4 }
 0x3e3   : > { %1026 = vmatpush.bf16.msrb.mxu3 %v1021_v36  ;;  %1055 = vmatpush.bf16.msrb.mxu2 %v1022_v35  ;;  %v1132_v20 = vadd.f32 %v1131_v43, %v1130_v37  ;;  %v1153_v22 = vadd.f32 %v1152_v16, %v1151_v32  ;;  %v915_v11 = vpop.permute.xlu1 %914  ;;  %v920_v26 = vpop.permute.xlu2 %919  ;;  %v991_v35 = vld [vmem:[#allocation3 + $0x58] sm:$0xff] }
 0x3e4   : > { %v972_v27 = vadd.f32 %v971_v54, %v915_v11  ;;  %v975_v8 = vadd.f32 %v974_v34, %v920_v26  ;;  %v992_v43 = vld [vmem:[#allocation3 + $0x18] sm:$0xff]  ;;  %v1002_v11 = vld [vmem:[#allocation3 + $0x70] sm:$0xff] }
 0x3e5   : > { %v1133_v5 = vrot.slane %v1132_v20, 2  ;;  %v1154_v57 = vrot.slane %v1153_v22, 2  ;;  %v976_v2 = vpop.f32.mrf.mxu2  ;;  %v1000_v54 = vld [vmem:[#allocation3 + $0x38] sm:$0xff] }
 0x3e6   : > { %v1005_v1 = vpack.c.bf16 %v972_v27, %v970_v25  ;;  %v1003_v34 = vld [vmem:[#allocation3 + $0x78] sm:$0xff] }
 0x3e7   : > { %1027 = vmatpush.bf16.msrb.mxu3 %v1019_v44  ;;  %1056 = vmatpush.bf16.msrb.mxu2 %v1020_v7  ;;  %v1134_v18 = vadd.f32 %v1133_v5, %v1132_v20  ;;  %v1155_v14 = vadd.f32 %v1154_v57, %v1153_v22  ;;  %v993_v7 = vld [vmem:[#allocation3 + $0x50] sm:$0xff]  ;;  %v994_v5 = vld [vmem:[#allocation3 + $0x68] sm:$0xff] }
 0x3e8   : > { %v986_v39 = vpop.f32.mrf.mxu3 }
 0x3e9   : > { %v1135_v55 = vrot.slane %v1134_v18, 1  ;;  %v1156_v9 = vrot.slane %v1155_v14, 1 }
 0x3eb   : > { %1028 = vmatpush.bf16.msrb.mxu3 %v1017_v46  ;;  %1057 = vmatpush.bf16.msrb.mxu2 %v1018_v21  ;;  %v1157_v40 = vadd.f32 %v1156_v9, %v1155_v14  ;;  %v1136_v33 = vadd.f32 %v1135_v55, %v1134_v18  ;;  %v925_v6 = vpop.permute.xlu2 %924  ;;  %v930_v47 = vpop.permute.xlu1 %929  ;;  %v995_v46 = vld [vmem:[#allocation3 + $0x8] sm:$0xff] }
 0x3ec   : > { %v977_v58 = vadd.f32 %v976_v2, %v925_v6  ;;  %v980_v53 = vadd.f32 %v979_v3, %v930_v47  ;;  %v996_v21 = vld [vmem:[#allocation3 + $0x48] sm:$0xff] }
 0x3ed   : > { %v1160_v42 = vrot.slane %v1157_v40, 7 }
 0x3ee   : > { %v1006_v30 = vpack.c.bf16 %v977_v58, %v975_v8 }
 0x3ef   : > { %1029 = vmatpush.bf16.msrb.mxu3 %v1015_v59  ;;  %1058 = vmatpush.bf16.msrb.mxu2 %v1016_v0  ;;  %v1162_v41 = vsel %vm1161_vm4, %v1136_v33, %v1160_v42  ;;  %v997_v59 = vld [vmem:[#allocation3 + $0x40] sm:$0xff] }
 0x3f0   : > { %v1164_v60 = vadd.f32 %v1162_v41, %v1115_v56  ;;  %v998_v0 = vld [vmem:[#allocation3 + $0x20] sm:$0xff] }
 0x3f2   : > { %1169 = vst.msk [vmem:[#allocation4] sm:$0x3] %vm1167_vm5, %v1164_v60  ;;  %v999_v60 = vld [vmem:[#allocation3 + $0x10] sm:$0xff] }
 0x3f3   : > { %1030 = vmatpush.bf16.msrb.mxu3 %v1013_v19  ;;  %1059 = vmatpush.bf16.msrb.mxu2 %v1014_v24  ;;  %v935_v51 = vpop.permute.xlu2 %934  ;;  %v940_v23 = vpop.permute.xlu1 %939 }
 0x3f4   : > { %v982_v48 = vadd.f32 %v981_v52, %v935_v51  ;;  %v985_v49 = vadd.f32 %v984_v61, %v940_v23 }
 0x3f6   : > { %v1007_v17 = vpack.c.bf16 %v982_v48, %v980_v53 }
 0x3f7   : > { %1031 = vmatpush.bf16.msrb.mxu3 %v1011_v31  ;;  %1060 = vmatpush.bf16.msrb.mxu2 %v1012_v62  ;;  %v1001_v62 = vld [vmem:[#allocation3 + $0x60] sm:$0xff] }
 0x3fb   : > { %1032 = vmatpush.bf16.msrb.mxu3 %v1009_v38  ;;  %1061 = vmatpush.bf16.msrb.mxu2 %v1010_v28  ;;  %v945_v15 = vpop.permute.xlu2 %944 }
 0x3fc   : > { %v987_v10 = vadd.f32 %v986_v39, %v945_v15 }
 0x3fe   : > { %1033 = vmatmul.bf16.vlgmr.msrb.gmra.mxu3 %v1005_v1  ;;  %1062 = vmatmul.bf16.vlgmr.msrb.gmra.mxu2 %v1005_v1  ;;  %v1008_v12 = vpack.c.bf16 %v987_v10, %v985_v49  ;;  %v1004_v1 = vld [vmem:[#allocation3 + $0x28] sm:$0xff] }
 0x40e   : > { %1038 = vmatmul.bf16.gmra.mxu3 %v1006_v30  ;;  %1067 = vmatmul.bf16.gmra.mxu2 %v1006_v30 }
 0x41e   : > { %1043 = vmatmul.bf16.gmra.mxu3 %v1007_v17  ;;  %1072 = vmatmul.bf16.gmra.mxu2 %v1007_v17 }
 0x42e   : > { %1048 = vmatmul.bf16.gmra.mxu3 %v1008_v12  ;;  %1077 = vmatmul.bf16.gmra.mxu2 %v1008_v12 }
 0x481   : > { %v1034_v63 = vpop.f32.mrf.mxu3  ;;  %v1063_v37 = vpop.f32.mrf.mxu2 }
 0x482   : > { %v1083_v32 = vadd.f32 %v1034_v63, %v989_v50  ;;  %v1084_v36 = vadd.f32 %v1063_v37, %v990_v13 }
 0x484   : > { %1099 = vst [vmem:[#allocation3 + $0x30] sm:$0xff] %v1083_v32 }
 0x485   : > { %1100 = vst [vmem:[#allocation3] sm:$0xff] %v1084_v36 }
 0x489   : > { %v1036_v16 = vpop.f32.mrf.mxu3  ;;  %v1065_v20 = vpop.f32.mrf.mxu2 }
 0x48a   : > { %v1085_v22 = vadd.f32 %v1036_v16, %v991_v35  ;;  %v1086_v44 = vadd.f32 %v1065_v20, %v992_v43 }
 0x48c   : > { %1101 = vst [vmem:[#allocation3 + $0x58] sm:$0xff] %v1085_v22 }
 0x48d   : > { %1102 = vst [vmem:[#allocation3 + $0x18] sm:$0xff] %v1086_v44 }
 0x491   : > { %v1039_v57 = vpop.f32.mrf.mxu3  ;;  %v1068_v45 = vpop.f32.mrf.mxu2 }
 0x492   : > { %v1087_v18 = vadd.f32 %v1039_v57, %v993_v7  ;;  %v1088_v14 = vadd.f32 %v1068_v45, %v994_v5 }
 0x494   : > { %1103 = vst [vmem:[#allocation3 + $0x50] sm:$0xff] %v1087_v18 }
 0x495   : > { %1104 = vst [vmem:[#allocation3 + $0x68] sm:$0xff] %v1088_v14 }
 0x499   : > { %v1041_v55 = vpop.f32.mrf.mxu3  ;;  %v1070_v9 = vpop.f32.mrf.mxu2 }
 0x49a   : > { %v1089_v40 = vadd.f32 %v1041_v55, %v995_v46  ;;  %v1090_v4 = vadd.f32 %v1070_v9, %v996_v21 }
 0x49c   : > { %1105 = vst [vmem:[#allocation3 + $0x8] sm:$0xff] %v1089_v40 }
 0x49d   : > { %1106 = vst [vmem:[#allocation3 + $0x48] sm:$0xff] %v1090_v4 }
 0x4a1   : > { %v1044_v33 = vpop.f32.mrf.mxu3  ;;  %v1073_v56 = vpop.f32.mrf.mxu2 }
 0x4a2   : > { %v1091_v42 = vadd.f32 %v1044_v33, %v997_v59  ;;  %v1092_v41 = vadd.f32 %v1073_v56, %v998_v0 }
 0x4a4   : > { %1107 = vst [vmem:[#allocation3 + $0x40] sm:$0xff] %v1091_v42 }
 0x4a5   : > { %1108 = vst [vmem:[#allocation3 + $0x20] sm:$0xff] %v1092_v41 }
 0x4a9   : > { %v1046_v19 = vpop.f32.mrf.mxu3  ;;  %v1075_v24 = vpop.f32.mrf.mxu2 }
 0x4aa   : > { %v1093_v29 = vadd.f32 %v1046_v19, %v999_v60  ;;  %v1094_v31 = vadd.f32 %v1075_v24, %v1000_v54 }
 0x4ac   : > { %1109 = vst [vmem:[#allocation3 + $0x10] sm:$0xff] %v1093_v29 }
 0x4ad   : > { %1110 = vst [vmem:[#allocation3 + $0x38] sm:$0xff] %v1094_v31 }
 0x4b1   : > { %v1049_v25 = vpop.f32.mrf.mxu3  ;;  %v1078_v27 = vpop.f32.mrf.mxu2 }
 0x4b2   : > { %v1095_v38 = vadd.f32 %v1049_v25, %v1001_v62  ;;  %v1096_v28 = vadd.f32 %v1078_v27, %v1002_v11 }
 0x4b4   : > { %1111 = vst [vmem:[#allocation3 + $0x60] sm:$0xff] %v1095_v38 }
 0x4b5   : > { %1112 = vst [vmem:[#allocation3 + $0x70] sm:$0xff] %v1096_v28 }
 0x4b9   : > { %v1051_v26 = vpop.f32.mrf.mxu3  ;;  %v1080_v2 = vpop.f32.mrf.mxu2  ;;  %1173 = sbr.rel (%p1715_p1) target bundleno = 1537 (0x601), region = 60 }
 0x4ba   : > { %v1097_v3 = vadd.f32 %v1051_v26, %v1003_v34  ;;  %v1098_v6 = vadd.f32 %v1080_v2, %v1004_v1 }
 0x4bc   : > { %1113 = vst [vmem:[#allocation3 + $0x78] sm:$0xff] %v1097_v3 }
 0x4bd   : > { %1114 = vst [vmem:[#allocation3 + $0x28] sm:$0xff] %v1098_v6 }
 0x4be   : > { %v1174_v8 = vld [vmem:[#allocation4] sm:$0x3]  ;;  %v2121_v30 = vmov 0   ;;  %v1266_v51 = vld [vmem:[%s2987_s24] sm:$0xff]  ;;  %v1189_v48 = vld [vmem:[%s2287_s19 + $0x60] sm:$0xff]  ;;  %vm1424_vm6 = vcmask 7168  }
 0x4bf   : > { %v1175_v58 = vadd.f32 1e-09, %v1174_v8  ;;  %1945 = vset.pattern.permute.xlu0 %v2121_v30  ;;  %1946 = vset.pattern.permute.xlu1 %v2121_v30  ;;  %v1205_v52 = vld [vmem:[#allocation3 + $0x60] sm:$0xff]  ;;  %v1191_v61 = vld [vmem:[%s2287_s19 + $0x70] sm:$0xff]  ;;  %v1190_v13 = vld [vmem:[%s2287_s19 + $0x68] sm:$0xff] }
 0x4c0   : > { %1947 = vset.pattern.permute.xlu2 %v2121_v30  ;;  %v1206_v17 = vld [vmem:[#allocation3 + $0x70] sm:$0xff]  ;;  %v1201_v39 = vld [vmem:[#allocation3 + $0x40] sm:$0xff]  ;;  %1276 = vperm.xlu0 %1945, %v1266_v51   ;;  %v1204_v50 = vld [vmem:[#allocation3 + $0x38] sm:$0xff] }
 0x4c1   : > { %1948 = vrcp.f32 %v1175_v58  ;;  %v1203_v49 = vld [vmem:[#allocation3 + $0x10] sm:$0xff]  ;;  %v1202_v12 = vld [vmem:[#allocation3 + $0x20] sm:$0xff]  ;;  %v1199_v18 = vld [vmem:[#allocation3 + $0x8] sm:$0xff] }
 0x4c2   : > { %v1192_v63 = vld [vmem:[%s2287_s19 + $0x78] sm:$0xff]  ;;  %v1185_v37 = vld [vmem:[%s2287_s19 + $0x40] sm:$0xff]  ;;  %v1187_v16 = vld [vmem:[%s2287_s19 + $0x50] sm:$0xff] }
 0x4c3   : > { %v1207_v47 = vld [vmem:[#allocation3 + $0x78] sm:$0xff]  ;;  %v1186_v20 = vld [vmem:[%s2287_s19 + $0x48] sm:$0xff]  ;;  %v1268_v14 = vld [vmem:[%s2987_s24 + $0x10] sm:$0xff] }
 0x4c4   : > { %v1208_v15 = vld [vmem:[#allocation3 + $0x28] sm:$0xff]  ;;  %v1188_v22 = vld [vmem:[%s2287_s19 + $0x58] sm:$0xff]  ;;  %v1197_v45 = vld [vmem:[#allocation3 + $0x50] sm:$0xff]  ;;  %1286 = vperm.xlu1 %1946, %v1268_v14  }
 0x4c5   : > { %v1198_v40 = vld [vmem:[#allocation3 + $0x68] sm:$0xff]  ;;  %v1267_v59 = vld [vmem:[%s2987_s24 + $0x8] sm:$0xff]  ;;  %v1193_v54 = vld [vmem:[#allocation3 + $0x30] sm:$0xff] }
 0x4c6   : > { %v1200_v4 = vld [vmem:[#allocation3 + $0x48] sm:$0xff]  ;;  %v1183_v60 = vld [vmem:[%s2287_s19 + $0x30] sm:$0xff]  ;;  %v1184_v11 = vld [vmem:[%s2287_s19 + $0x38] sm:$0xff] }
 0x4c7   : > { %v1949_v53 = vpop.eup %1948  ;;  %v1181_v41 = vld [vmem:[%s2287_s19 + $0x20] sm:$0xff]  ;;  %v1182_v62 = vld [vmem:[%s2287_s19 + $0x28] sm:$0xff]  ;;  %v1195_v25 = vld [vmem:[#allocation3 + $0x58] sm:$0xff] }
 0x4c8   : > { %v2774_v23 = vperm.slane %v1949_v53, 0  ;;  %v2776_v10 = vperm.slane %v1949_v53, 1  ;;  %v1194_v1 = vld [vmem:[#allocation3] sm:$0xff]  ;;  %v1196_v26 = vld [vmem:[#allocation3 + $0x18] sm:$0xff]  ;;  %1281 = vperm.xlu0 %1945, %v1267_v59   ;;  %v1270_v8 = vld [vmem:[%s2987_s24 + $0x20] sm:$0xff] }
 0x4c9   : > { %v1178_v53 = vld [vmem:[%s2287_s19 + $0x8] sm:$0xff]  ;;  %1296 = vperm.xlu2 %1947, %v1270_v8  }
 0x4ca   : > { %v1226_v32 = vmul.f32 %v2774_v23, %v1205_v52  ;;  %v1228_v36 = vmul.f32 %v2774_v23, %v1207_v47  ;;  %v1227_v35 = vmul.f32 %v2776_v10, %v1206_v17  ;;  %v1229_v43 = vmul.f32 %v2776_v10, %v1208_v15  ;;  %v1177_v52 = vld [vmem:[%s2287_s19] sm:$0xff]  ;;  %v1179_v47 = vld [vmem:[%s2287_s19 + $0x10] sm:$0xff] }
 0x4cb   : > { %v1222_v44 = vmul.f32 %v2774_v23, %v1201_v39  ;;  %v1224_v7 = vmul.f32 %v2774_v23, %v1203_v49  ;;  %v1223_v5 = vmul.f32 %v2776_v10, %v1202_v12  ;;  %v1225_v57 = vmul.f32 %v2776_v10, %v1204_v50  ;;  %v1269_v15 = vld [vmem:[%s2987_s24 + $0x18] sm:$0xff] }
 0x4cc   : > { %v1254_v46 = vsub.f32 %v1189_v48, %v1226_v32  ;;  %v1256_v21 = vsub.f32 %v1191_v61, %v1228_v36  ;;  %v1255_v55 = vsub.f32 %v1190_v13, %v1227_v35  ;;  %v1257_v9 = vsub.f32 %v1192_v63, %v1229_v43  ;;  %v1180_v48 = vld [vmem:[%s2287_s19 + $0x18] sm:$0xff]  ;;  %1291 = vperm.xlu1 %1946, %v1269_v15   ;;  %v1234_v35 = vld [vmem:[%s2988_s21 + $0x20] sm:$0xff] }
 0x4cd   : > { %v1250_v0 = vsub.f32 %v1185_v37, %v1222_v44  ;;  %v1252_v33 = vsub.f32 %v1187_v16, %v1224_v7  ;;  %v1251_v56 = vsub.f32 %v1186_v20, %v1223_v5  ;;  %v1253_v42 = vsub.f32 %v1188_v22, %v1225_v57  ;;  %v1271_v37 = vld [vmem:[%s2987_s24 + $0x28] sm:$0xff]  ;;  %v1273_v44 = vld [vmem:[%s2987_s24 + $0x38] sm:$0xff]  ;;  %v1232_v7 = vld [vmem:[%s2988_s21 + $0x10] sm:$0xff] }
 0x4ce   : > { %v1264_v19 = vpack.c.bf16 %v1256_v21, %v1254_v46  ;;  %v1265_v24 = vpack.c.bf16 %v1257_v9, %v1255_v55  ;;  %v1218_v29 = vmul.f32 %v2774_v23, %v1197_v45  ;;  %v1220_v31 = vmul.f32 %v2774_v23, %v1199_v18  ;;  %v1231_v36 = vld [vmem:[%s2988_s21 + $0x8] sm:$0xff]  ;;  %v1233_v5 = vld [vmem:[%s2988_s21 + $0x18] sm:$0xff]  ;;  %v1236_v57 = vld [vmem:[%s2988_s21 + $0x30] sm:$0xff] }
 0x4cf   : > { %v1262_v27 = vpack.c.bf16 %v1252_v33, %v1250_v0  ;;  %v1263_v38 = vpack.c.bf16 %v1253_v42, %v1251_v56  ;;  %v1219_v28 = vmul.f32 %v2776_v10, %v1198_v40  ;;  %v1221_v34 = vmul.f32 %v2776_v10, %v1200_v4  ;;  %v1235_v43 = vld [vmem:[%s2988_s21 + $0x28] sm:$0xff]  ;;  %v1237_v45 = vld [vmem:[%s2988_s21 + $0x38] sm:$0xff] }
 0x4d0   : > { %1330 = vmatpush.bf16.msra.mxu0 %v1264_v19  ;;  %1740 = vmatpush.bf16.msra.mxu2 %v1264_v19  ;;  %v1246_v2 = vsub.f32 %v1181_v41, %v1218_v29  ;;  %v1248_v3 = vsub.f32 %v1183_v60, %v1220_v31  ;;  %v1214_v6 = vmul.f32 %v2774_v23, %v1193_v54 }
 0x4d1   : > { %1359 = vmatpush.bf16.msra.mxu1 %v1265_v24  ;;  %1744 = vmatpush.bf16.msra.mxu3 %v1265_v24  ;;  %v1247_v58 = vsub.f32 %v1182_v62, %v1219_v28  ;;  %v1249_v30 = vsub.f32 %v1184_v11, %v1221_v34  ;;  %v1216_v51 = vmul.f32 %v2774_v23, %v1195_v25  ;;  %v1272_v23 = vld [vmem:[%s2987_s24 + $0x30] sm:$0xff] }
 0x4d2   : > { %v1215_v61 = vmul.f32 %v2776_v10, %v1194_v1  ;;  %v1217_v17 = vmul.f32 %v2776_v10, %v1196_v26  ;;  %v1260_v39 = vpack.c.bf16 %v1248_v3, %v1246_v2  ;;  %v1242_v49 = vsub.f32 %v1177_v52, %v1214_v6  ;;  %v1230_v10 = vld [vmem:[%s2988_s21] sm:$0xff]  ;;  %1306 = vperm.xlu0 %1945, %v1272_v23  }
 0x4d3   : > { %v1244_v12 = vsub.f32 %v1179_v47, %v1216_v51  ;;  %v1261_v50 = vpack.c.bf16 %v1249_v30, %v1247_v58  ;;  %1301 = vperm.xlu2 %1947, %v1271_v37   ;;  %v1238_v20 = vpack.c.bf16 %v1231_v36, %v1230_v10  ;;  %v1240_v22 = vpack.c.bf16 %v1235_v43, %v1234_v35 }
 0x4d4   : > { %1331 = vmatpush.bf16.msra.mxu0 %v1262_v27  ;;  %1741 = vmatpush.bf16.msra.mxu2 %v1262_v27  ;;  %v1243_v13 = vsub.f32 %v1178_v53, %v1215_v61  ;;  %v1245_v63 = vsub.f32 %v1180_v48, %v1217_v17  ;;  %v1239_v18 = vpack.c.bf16 %v1233_v5, %v1232_v7 }
 0x4d5   : > { %1360 = vmatpush.bf16.msra.mxu1 %v1263_v38  ;;  %1745 = vmatpush.bf16.msra.mxu3 %v1263_v38  ;;  %v1258_v32 = vpack.c.bf16 %v1244_v12, %v1242_v49  ;;  %v1241_v14 = vpack.c.bf16 %v1237_v45, %v1236_v57 }
 0x4d6   : > { %v1259_v16 = vpack.c.bf16 %v1245_v63, %v1243_v13  ;;  %1311 = vperm.xlu1 %1946, %v1273_v44  }
 0x4d8   : > { %1332 = vmatpush.bf16.msra.mxu0 %v1260_v39  ;;  %1742 = vmatpush.bf16.msra.mxu2 %v1260_v39 }
 0x4d9   : > { %1361 = vmatpush.bf16.msra.mxu1 %v1261_v50  ;;  %1746 = vmatpush.bf16.msra.mxu3 %v1261_v50 }
 0x4dc   : > { %1333 = vmatpush.bf16.msra.mxu0 %v1258_v32  ;;  %1743 = vmatpush.bf16.msra.mxu2 %v1258_v32 }
 0x4dd   : > { %1362 = vmatpush.bf16.msra.mxu1 %v1259_v16  ;;  %1747 = vmatpush.bf16.msra.mxu3 %v1259_v16 }
 0x4df   : > { %1716 = vmatmul.msk.bf16.vlgmr.msra.gmra.mxu0 %vm947_vm3, %v1238_v20  ;;  %1718 = vmatmul.msk.bf16.vlgmr.msra.gmra.mxu2 %vm947_vm3, %v1240_v22 }
 0x4e0   : > { %1720 = vmatmul.msk.bf16.vlgmr.msra.gmra.mxu1 %vm947_vm3, %v1238_v20  ;;  %1722 = vmatmul.msk.bf16.vlgmr.msra.gmra.mxu3 %vm947_vm3, %v1240_v22 }
 0x4ef   : > { %1717 = vmatmul.msk.bf16.gmra.mxu0 %vm947_vm3, %v1239_v18  ;;  %1719 = vmatmul.msk.bf16.gmra.mxu2 %vm947_vm3, %v1241_v14 }
 0x4f0   : > { %1721 = vmatmul.msk.bf16.gmra.mxu1 %vm947_vm3, %v1239_v18  ;;  %1723 = vmatmul.msk.bf16.gmra.mxu3 %vm947_vm3, %v1241_v14 }
 0x523   : > { %v1297_v59 = vpop.permute.xlu2 %1296 }
 0x52d   : > { %v1302_v34 = vpop.permute.xlu2 %1301 }
 0x532   : > { %v1277_v46 = vpop.permute.xlu0 %1276 }
 0x536   : > { %v1287_v11 = vpop.permute.xlu1 %1286 }
 0x53a   : > { %v1282_v54 = vpop.permute.xlu0 %1281 }
 0x53e   : > { %v1292_v48 = vpop.permute.xlu1 %1291 }
 0x544   : > { %v1307_v15 = vpop.permute.xlu0 %1306 }
 0x548   : > { %v1312_v16 = vpop.permute.xlu1 %1311 }
 0x55c   : > { %v1335_v21 = vpop.f32.mrf.mxu0 }
 0x55d   : > { %v1336_v55 = vadd.f32 %v1335_v21, %v1277_v46  ;;  %v1364_v9 = vpop.f32.mrf.mxu1 }
 0x55e   : > { %v1365_v40 = vadd.f32 %v1364_v9, %v1277_v46 }
 0x55f   : > { %1384 = vst [vmem:[%s2309_s23] sm:$0xff] %v1336_v55  ;;  %v1433_v4 = vmul.f32 %v1336_v55, %v1336_v55 }
 0x560   : > { %1385 = vst [vmem:[%s2309_s23 + $0x8] sm:$0xff] %v1365_v40  ;;  %v1400_v0 = vadd.f32 %v1365_v40, %v1336_v55  ;;  %v1434_v33 = vmul.f32 %v1365_v40, %v1365_v40 }
 0x562   : > { %1401 = vadd.xlane.f32.xlu2 %v1400_v0  ;;  %v1345_v56 = vpop.f32.mrf.mxu2  ;;  %v1449_v42 = vadd.f32 %v1434_v33, %v1433_v4 }
 0x563   : > { %v1346_v41 = vadd.f32 %v1345_v56, %v1297_v59  ;;  %v1374_v60 = vpop.f32.mrf.mxu3 }
 0x564   : > { %v1375_v19 = vadd.f32 %v1374_v60, %v1297_v59  ;;  %1450 = vadd.xlane.f32.xlu0 %v1449_v42  ;;  %v1337_v24 = vpop.f32.mrf.mxu0 }
 0x565   : > { %1392 = vst [vmem:[%s2309_s23 + $0x40] sm:$0xff] %v1346_v41  ;;  %v1338_v29 = vadd.f32 %v1337_v24, %v1282_v54  ;;  %v1366_v31 = vpop.f32.mrf.mxu1  ;;  %v1441_v62 = vmul.f32 %v1346_v41, %v1346_v41 }
 0x566   : > { %1393 = vst [vmem:[%s2309_s23 + $0x48] sm:$0xff] %v1375_v19  ;;  %v1367_v25 = vadd.f32 %v1366_v31, %v1282_v54  ;;  %v1442_v27 = vmul.f32 %v1375_v19, %v1375_v19  ;;  %v1412_v38 = vadd.f32 %v1375_v19, %v1346_v41 }
 0x567   : > { %1386 = vst [vmem:[%s2309_s23 + $0x10] sm:$0xff] %v1338_v29  ;;  %v1435_v58 = vmul.f32 %v1338_v29, %v1338_v29 }
 0x568   : > { %1387 = vst [vmem:[%s2309_s23 + $0x18] sm:$0xff] %v1367_v25  ;;  %v1461_v28 = vadd.f32 %v1442_v27, %v1441_v62  ;;  %v1403_v26 = vadd.f32 %v1367_v25, %v1338_v29  ;;  %v1436_v30 = vmul.f32 %v1367_v25, %v1367_v25 }
 0x56a   : > { %1462 = vadd.xlane.f32.xlu1 %v1461_v28  ;;  %1413 = vadd.xlane.f32.xlu2 %v1412_v38  ;;  %v1347_v1 = vpop.f32.mrf.mxu2  ;;  %v1452_v61 = vadd.f32 %v1436_v30, %v1435_v58 }
 0x56b   : > { %v1348_v2 = vadd.f32 %v1347_v1, %v1302_v34  ;;  %v1376_v3 = vpop.f32.mrf.mxu3 }
 0x56c   : > { %v1377_v6 = vadd.f32 %v1376_v3, %v1302_v34  ;;  %1404 = vadd.xlane.f32.xlu0 %v1403_v26  ;;  %v1340_v8 = vpop.f32.mrf.mxu0 }
 0x56d   : > { %1394 = vst [vmem:[%s2309_s23 + $0x50] sm:$0xff] %v1348_v2  ;;  %v1341_v52 = vadd.f32 %v1340_v8, %v1287_v11  ;;  %v1369_v47 = vpop.f32.mrf.mxu1  ;;  %v1443_v40 = vmul.f32 %v1348_v2, %v1348_v2 }
 0x56e   : > { %1395 = vst [vmem:[%s2309_s23 + $0x58] sm:$0xff] %v1377_v6  ;;  %v1370_v51 = vadd.f32 %v1369_v47, %v1287_v11  ;;  %v1415_v49 = vadd.f32 %v1377_v6, %v1348_v2  ;;  %v1444_v4 = vmul.f32 %v1377_v6, %v1377_v6 }
 0x56f   : > { %1388 = vst [vmem:[%s2309_s23 + $0x20] sm:$0xff] %v1341_v52  ;;  %v1437_v53 = vmul.f32 %v1341_v52, %v1341_v52 }
 0x570   : > { %1389 = vst [vmem:[%s2309_s23 + $0x28] sm:$0xff] %v1370_v51  ;;  %v1438_v17 = vmul.f32 %v1370_v51, %v1370_v51  ;;  %v1406_v35 = vadd.f32 %v1370_v51, %v1341_v52  ;;  %v1464_v0 = vadd.f32 %v1444_v4, %v1443_v40 }
 0x572   : > { %1453 = vadd.xlane.f32.xlu1 %v1452_v61  ;;  %v1350_v39 = vpop.f32.mrf.mxu2  ;;  %v1455_v12 = vadd.f32 %v1438_v17, %v1437_v53 }
 0x573   : > { %v1351_v23 = vadd.f32 %v1350_v39, %v1307_v15  ;;  %v1379_v50 = vpop.f32.mrf.mxu3 }
 0x574   : > { %v1380_v13 = vadd.f32 %v1379_v50, %v1307_v15  ;;  %1416 = vadd.xlane.f32.xlu0 %v1415_v49  ;;  %1456 = vadd.xlane.f32.xlu2 %v1455_v12  ;;  %v1342_v63 = vpop.f32.mrf.mxu0 }
 0x575   : > { %1396 = vst [vmem:[%s2309_s23 + $0x60] sm:$0xff] %v1351_v23  ;;  %v1343_v10 = vadd.f32 %v1342_v63, %v1292_v48  ;;  %v1371_v37 = vpop.f32.mrf.mxu1  ;;  %v1445_v45 = vmul.f32 %v1351_v23, %v1351_v23 }
 0x576   : > { %1397 = vst [vmem:[%s2309_s23 + $0x68] sm:$0xff] %v1380_v13  ;;  %v1372_v32 = vadd.f32 %v1371_v37, %v1292_v48  ;;  %v1446_v18 = vmul.f32 %v1380_v13, %v1380_v13  ;;  %v1418_v14 = vadd.f32 %v1380_v13, %v1351_v23 }
 0x577   : > { %1390 = vst [vmem:[%s2309_s23 + $0x30] sm:$0xff] %v1343_v10  ;;  %v1439_v36 = vmul.f32 %v1343_v10, %v1343_v10 }
 0x578   : > { %1391 = vst [vmem:[%s2309_s23 + $0x38] sm:$0xff] %v1372_v32  ;;  %v1440_v43 = vmul.f32 %v1372_v32, %v1372_v32  ;;  %v1409_v44 = vadd.f32 %v1372_v32, %v1343_v10  ;;  %v1467_v46 = vadd.f32 %v1446_v18, %v1445_v45 }
 0x57a   : > { %1407 = vadd.xlane.f32.xlu1 %v1406_v35  ;;  %v1352_v20 = vpop.f32.mrf.mxu2  ;;  %v1458_v22 = vadd.f32 %v1440_v43, %v1439_v36 }
 0x57b   : > { %v1353_v7 = vadd.f32 %v1352_v20, %v1312_v16  ;;  %v1381_v5 = vpop.f32.mrf.mxu3 }
 0x57c   : > { %v1382_v57 = vadd.f32 %v1381_v5, %v1312_v16  ;;  %1459 = vadd.xlane.f32.xlu0 %v1458_v22  ;;  %1410 = vadd.xlane.f32.xlu2 %v1409_v44 }
 0x57d   : > { %1398 = vst [vmem:[%s2309_s23 + $0x70] sm:$0xff] %v1353_v7  ;;  %v1447_v55 = vmul.f32 %v1353_v7, %v1353_v7 }
 0x57e   : > { %1399 = vst [vmem:[%s2309_s23 + $0x78] sm:$0xff] %v1382_v57  ;;  %v1421_v21 = vadd.f32 %v1382_v57, %v1353_v7  ;;  %v1448_v9 = vmul.f32 %v1382_v57, %v1382_v57 }
 0x580   : > { %v1470_v59 = vadd.f32 %v1448_v9, %v1447_v55 }
 0x582   : > { %1419 = vadd.xlane.f32.xlu1 %v1418_v14 }
 0x584   : > { %1468 = vadd.xlane.f32.xlu0 %v1467_v46  ;;  %1422 = vadd.xlane.f32.xlu2 %v1421_v21 }
 0x58a   : > { %1471 = vadd.xlane.f32.xlu1 %v1470_v59 }
 0x58c   : > { %1465 = vadd.xlane.f32.xlu2 %v1464_v0 }
 0x5d5   : > { %v1402_v33 = vpop.xlane.xlu2 %1401 }
 0x5d6   : > { %1425 = vst.msk [vmem:[%s2302_s22] sm:$0xff] %vm1424_vm6, %v1402_v33 }
 0x5d7   : > { %v1451_v56 = vpop.xlane.xlu0 %1450 }
 0x5d8   : > { %1473 = vst.msk [vmem:[%s2307_s17] sm:$0xff] %vm1424_vm6, %v1451_v56 }
 0x5dd   : > { %v1463_v42 = vpop.xlane.xlu1 %1462  ;;  %v1414_v41 = vpop.xlane.xlu2 %1413 }
 0x5de   : > { %1477 = vst.msk [vmem:[%s2307_s17 + $0x20] sm:$0xff] %vm1424_vm6, %v1463_v42 }
 0x5df   : > { %1429 = vst.msk [vmem:[%s2302_s22 + $0x20] sm:$0xff] %vm1424_vm6, %v1414_v41  ;;  %v1405_v60 = vpop.xlane.xlu0 %1404 }
 0x5e0   : > { %1426 = vst.msk [vmem:[%s2302_s22 + $0x8] sm:$0xff] %vm1424_vm6, %v1405_v60 }
 0x5e5   : > { %v1454_v54 = vpop.xlane.xlu1 %1453 }
 0x5e6   : > { %1474 = vst.msk [vmem:[%s2307_s17 + $0x8] sm:$0xff] %vm1424_vm6, %v1454_v54 }
 0x5e7   : > { %v1417_v19 = vpop.xlane.xlu0 %1416  ;;  %v1457_v24 = vpop.xlane.xlu2 %1456 }
 0x5e8   : > { %1430 = vst.msk [vmem:[%s2302_s22 + $0x28] sm:$0xff] %vm1424_vm6, %v1417_v19 }
 0x5e9   : > { %1475 = vst.msk [vmem:[%s2307_s17 + $0x10] sm:$0xff] %vm1424_vm6, %v1457_v24 }
 0x5ed   : > { %v1408_v29 = vpop.xlane.xlu1 %1407 }
 0x5ee   : > { %1427 = vst.msk [vmem:[%s2302_s22 + $0x10] sm:$0xff] %vm1424_vm6, %v1408_v29 }
 0x5ef   : > { %v1460_v31 = vpop.xlane.xlu0 %1459  ;;  %v1411_v62 = vpop.xlane.xlu2 %1410 }
 0x5f0   : > { %1476 = vst.msk [vmem:[%s2307_s17 + $0x18] sm:$0xff] %vm1424_vm6, %v1460_v31 }
 0x5f1   : > { %1428 = vst.msk [vmem:[%s2302_s22 + $0x18] sm:$0xff] %vm1424_vm6, %v1411_v62 }
 0x5f5   : > { %v1420_v11 = vpop.xlane.xlu1 %1419 }
 0x5f6   : > { %1431 = vst.msk [vmem:[%s2302_s22 + $0x30] sm:$0xff] %vm1424_vm6, %v1420_v11 }
 0x5f7   : > { %v1469_v25 = vpop.xlane.xlu0 %1468  ;;  %v1423_v27 = vpop.xlane.xlu2 %1422 }
 0x5f8   : > { %1479 = vst.msk [vmem:[%s2307_s17 + $0x30] sm:$0xff] %vm1424_vm6, %v1469_v25 }
 0x5f9   : > { %1432 = vst.msk [vmem:[%s2302_s22 + $0x38] sm:$0xff] %vm1424_vm6, %v1423_v27 }
 0x5fd   : > { %v1472_v38 = vpop.xlane.xlu1 %1471 }
 0x5fe   : > { %1480 = vst.msk [vmem:[%s2307_s17 + $0x38] sm:$0xff] %vm1424_vm6, %v1472_v38 }
 0x5ff   : > { %v1466_v28 = vpop.xlane.xlu2 %1465 }
 0x600   : > { %1478 = vst.msk [vmem:[%s2307_s17 + $0x28] sm:$0xff] %vm1424_vm6, %v1466_v28 }
 0x601 PF: > { %s1735_s13 = sshll.u32 %s2100_s9, 7  ;;  %s2990_s6 = sld [smem:[#allocation22_spill]] }
 0x602   : > { %s1504_s19 = sshll.u32 %s2309_s23, 4  ;;  %s1482_s22 = scalar_lea.sflag [#allocation7], %s2283_s1  ;;  %s1505_s19 = int_to_ptr.vmem [resolvable:$true] %s1504_s19 }
 0x607   : > { %s1503_s18 = scalar_lea.hbm %s2990_s6, %s1735_s13  ;;  %s2030_s9 = scalar_lea.hbm %s2990_s6, 256 }
 0x608   : > { %s1506_s20 = sshll.u32 %s1503_s18, 4  ;;  %s1507_s20 = int_to_ptr.hbm [resolvable:$true] %s1506_s20 }
 0x609   : > { %s2024_s15 = sshra.s32 %s1507_s20, 4  ;;  %s2025_s15 = int_to_ptr.hbm [resolvable:$true] %s2024_s15 }
 0x60a   : > { %s2026_s30 = scalar_lea.hbm %s2025_s15, 128  ;;  %p2031_p13 = scmp.lt.s32.totalorder %s2025_s15, %s2990_s6 }
 0x60b   : > { %p2027_p10 = scmp.ne.s32.totalorder %s2025_s15, %s2026_s30  ;;  %p2032_p3 = scmp.lt.s32.totalorder %s2030_s9, %s2026_s30 }
 0x60d   : > { %p2028_p11 = pnand %p2027_p10, %p2255_p0  ;;  %p2033_p5 = por %p2032_p3, %p2031_p13 }
 0x60f   : > { %p2029_p12 = pneg %p2028_p11 }
 0x611   : > { %p2034_p7 = pnand %p2033_p5, %p2029_p12 }
 0x613   : > { %2037 = shalt.err (!%p2034_p7)
}
 0x614   : > { %s2122_s1 = smov 256   ;;  %s2123_s23 = smov 16  }
 0x615   : > { %1754 = dma.vmem_to_hbm [thread:$0]  (%p2255_p0), %s1505_s19, 2048, %s1507_s20, %s1482_s22, %s2122_s1, %s2122_s1, %s2123_s23  }
 0x616 PF: > { %s2991_s13 = sld [smem:[#allocation14_spill]]  ;;  %p1771_p9 = scmp.ge.s32.totalorder %s2112_s12, 2 }
 0x618   : > { %p1765_p2 = pnand %p1771_p9, %p2228_p6 }
 0x61a   : > { %p1766_p8 = pneg %p1765_p2 }
 0x61c   : > { %s1527_s5 = sand.u32 1, %s2991_s13  }
 0x61d   : > { %s1528_s18 = scalar_lea.sflag [#allocation7], %s1527_s5 }
 0x61e   : > { %2079 = dma.done.wait (%p1766_p8), %s1528_s18, 2048  }
 0x61f   : > { %2081 = vsyncadd (%p1766_p8), %s1528_s18, 4294965248  ;;  %s26_s12 = sadd.s32 1, %s2112_s12   ;;  %s2993_s15 = smov %s2274_s27 }
 0x620   : > { %p23_p4 = scmp.ge.s32.totalorder %s26_s12, 6   ;;  %s2994_s30 = sld [smem:[#allocation15_spill]] }
 0x621   : > { %s2995_s10 = sld [smem:[#allocation17_spill]]  ;;  %s2996_s27 = smov %s2088_s28 }
 0x622   : > { %s2997_s28 = smov %s2092_s29  ;;  %s2998_s29 = smov %s2993_s15 }
 0x623   : > { %s2999_s9 = smov %s2108_s11  ;;  %s3000_s11 = smov %s3006_s14 }
 0x624   :  { %25 = sbr.rel (!%p23_p4) target bundleno = 13 (0xd), region = 127 }
 0x629   :  { %1550 = vsyncpa [#allocation6], 1 }
 0x62a   :  { %1552 = vsyncpa [#allocation6 + $0x1], 1 }
 0x62b   :  { %1553 = vsyncpa [#allocation9], 1 }
 0x62c   :  { %1554 = vsyncpa [#allocation7], 1 }
 0x62d   :  { %1556 = vsyncpa [#allocation7 + $0x1], 1 }

</bundles_post_ra>
